<compile_context>
chip_gen: v5e
topology: v5e:2x2
jax: 0.10.0
libtpu: 0.0.40
codegen_flags: <defaults>
</compile_context>

<pallas_src>
import math

import jax
import jax.numpy as jnp
from jax import lax
from jax.experimental import pallas as pl
from jax.experimental.pallas import tpu as pltpu

OUTPUT_DIM = 40          # DiscreteDecoder.output_dim (41 categories)
EMBED_DIM = 32           # chosen (module default is None -> would crash)
NUM_VAR = 8
DEG = 3
LATENT_SIZE = 2
OUT_LANES = 128          # lane-dense fused output width

_HALF_LOG_2PI = 0.5 * math.log(2.0 * math.pi)


# ---------------------------------------------------------------------------
# Shared (wrapper + kernel) static slab layouts
# ---------------------------------------------------------------------------
def _w_layout():
    E, C, NV, L, OUT = EMBED_DIM, NUM_VAR * DEG, NUM_VAR, LATENT_SIZE, OUTPUT_DIM + 1
    blocks = [
        ("w_enc_in", NV + C, 2 * E),   # blockdiag(ws, wce)
        ("wee",      2 * E,  E),
        ("w_head",   E,      2 * L),   # [wmu | wsig]
        ("w_dec_top", C,     2 * E),   # [wcd | 0]
        ("w_dec_bot", L,     2 * E),   # [0 | wl]
        ("wed",      2 * E,  E),
        ("wa",       1,      E),
        ("wi_cat",   E,      3 * E),   # [wir | wiz | win]
        ("wh_cat",   E,      3 * E),   # [whr | whz | whn]
        ("wro",      E,      OUT),
    ]
    layout, off, rmax = {}, 0, 0
    for name, r, c in blocks:
        layout[name] = (r, off, c)
        off += c
        rmax = max(rmax, r)
    return layout, rmax, off


def _b_layout():
    E, L, OUT = EMBED_DIM, LATENT_SIZE, OUTPUT_DIM + 1
    blocks = [
        ("b_enc_in", 2 * E), ("bee", E), ("b_head", 2 * L),
        ("b_dec_in", 2 * E), ("bed", E), ("ba", E),
        ("bi_cat", 3 * E), ("bh_cat", 3 * E), ("bro", OUT),
    ]
    layout, off = {}, 0
    for name, c in blocks:
        layout[name] = (off, c)
        off += c
    return layout, off


_W_LAYOUT, _W_ROWS, _W_COLS = _w_layout()
_B_LAYOUT, _B_COLS = _b_layout()


def _w(ref, name):
    r, off, c = _W_LAYOUT[name]
    return ref[0:r, off:off + c]


def _b(ref, name):
    off, c = _B_LAYOUT[name]
    return ref[:, off:off + c]


# ---------------------------------------------------------------------------
# Pallas kernel: full VAE_Solver forward (teacher forcing)
# ---------------------------------------------------------------------------
def _vae_kernel(data_ref, w_ref, b_ref, out_ref):
    f32 = jnp.float32
    E = EMBED_DIM
    L = LATENT_SIZE
    NV = NUM_VAR
    C = NUM_VAR * DEG
    OUT = OUTPUT_DIM + 1
    B = out_ref.shape[0]

    def dot(a, bm):
        return jnp.dot(a, bm, preferred_element_type=f32)

    def sigmoid(x):                      # explicit form (exp is an EUP op)
        return 1.0 / (1.0 + jnp.exp(-x))

    # --- data slab slices (cols: [sol_steps | sol | ctx | eps]) ---
    sol_steps = data_ref[:, 0:1]                              # [NV*B, 1] step-major
    sol = data_ref[0:B, 1:1 + NV]                             # [B, NV]
    enc_in = data_ref[0:B, 1:1 + NV + C]                      # [B, NV+C] = [sol|ctx]
    ctx = data_ref[0:B, 1 + NV:1 + NV + C]                    # [B, C]
    eps = data_ref[0:B, 1 + NV + C:1 + NV + C + L]            # [B, L]

    # ------------------------------ Encoder --------------------------------
    # [sol|ctx] @ blockdiag(ws, wce) -> [sol_emb | ctx_emb] in one push
    e1 = jnp.maximum(dot(enc_in, _w(w_ref, "w_enc_in")) + _b(b_ref, "b_enc_in"), 0.0)
    hx_e = jnp.maximum(dot(e1, _w(w_ref, "wee")) + _b(b_ref, "bee"), 0.0)
    ml = dot(hx_e, _w(w_ref, "w_head")) + _b(b_ref, "b_head")      # [B, 2L] = [mu|logvar]
    mu = ml[:, 0:L]
    log_var = ml[:, L:2 * L]
    std = jnp.exp(0.5 * log_var)
    z = mu + eps * std
    # Normal(mu, std).log_prob(Z).sum(dim=1); (Z - mu)/std == eps
    z_logp = jnp.sum(-0.5 * eps * eps - 0.5 * log_var - _HALF_LOG_2PI,
                     axis=1, keepdims=True)

    # --------------------- Decoder initial hidden state --------------------
    # [ctx|z] @ blockdiag(wcd, wl) split by row groups (ctx part is off the
    # serial z-chain), then the 2E-wide embedding in one push.
    d1 = jnp.maximum(dot(ctx, _w(w_ref, "w_dec_top"))
                     + dot(z, _w(w_ref, "w_dec_bot"))
                     + _b(b_ref, "b_dec_in"), 0.0)                 # [B, 2E]
    hx = jnp.maximum(dot(d1, _w(w_ref, "wed")) + _b(b_ref, "bed"), 0.0)

    # ---- hoisted teacher-forcing work (independent of the serial chain) ----
    # cont_to_cat (torch .int() truncates); clamp to valid category range.
    cat_steps = jnp.clip(((sol_steps + 1.0) * (OUTPUT_DIM / 2.0)).astype(jnp.int32),
                         0, OUTPUT_DIM)                            # [NV*B, 1]
    action_steps = -1.0 + cat_steps.astype(f32) * (2.0 / OUTPUT_DIM)
    # action_embedder (rank-1 broadcast) + ALL input-side GRU projections in
    # one [NV*B, E] x [E, 3E] matmul.
    act_emb = jnp.maximum(action_steps * _w(w_ref, "wa") + _b(b_ref, "ba"), 0.0)
    gi_all = dot(act_emb, _w(w_ref, "wi_cat")) + _b(b_ref, "bi_cat")  # [NV*B, 3E]

    cat_all = jnp.clip(((sol + 1.0) * (OUTPUT_DIM / 2.0)).astype(jnp.int32),
                       0, OUTPUT_DIM)                              # [B, NV]

    wh = _w(w_ref, "wh_cat")                                       # [E, 3E]
    bh = _b(b_ref, "bh_cat")

    # ---- serial GRU recurrence (statically unrolled); readout deferred ----
    hx_list = []
    for i in range(NV):
        hx_list.append(hx)                    # pre-update state feeds the readout
        gh = dot(hx, wh) + bh                 # gates-only matmul (N = 3E)
        gi = gi_all[i * B:(i + 1) * B, :]
        r = sigmoid(gi[:, 0:E] + gh[:, 0:E])
        zg = sigmoid(gi[:, E:2 * E] + gh[:, E:2 * E])
        n = jnp.tanh(gi[:, 2 * E:3 * E] + r * gh[:, 2 * E:3 * E])
        hx = (1.0 - zg) * n + zg * hx

    # ---- post-loop readout + teacher log-probs (off the serial chain) ----
    wro = _w(w_ref, "wro")
    bro = _b(b_ref, "bro")
    iota = lax.broadcasted_iota(jnp.int32, (B, OUT), 1)
    logp_sum = jnp.zeros((B, 1), f32)
    for i in range(NV):
        logits = dot(hx_list[i], wro) + bro                        # [B, OUT]
        m = jnp.max(logits, axis=1, keepdims=True)
        lse = m + jnp.log(jnp.sum(jnp.exp(logits - m), axis=1, keepdims=True))
        teach = jnp.sum(jnp.where(iota == cat_all[:, i:i + 1], logits, 0.0),
                        axis=1, keepdims=True)
        logp_sum = logp_sum + teach - lse

    # ---- one lane-dense output slab: [mu | logvar | z | z_logp | logp] ----
    out_ref[...] = jnp.zeros(out_ref.shape, f32)
    out_ref[:, 0:2 * L] = ml
    out_ref[:, 2 * L:3 * L] = z
    out_ref[:, 3 * L:3 * L + 1] = z_logp
    out_ref[:, 3 * L + 1:3 * L + 2] = logp_sum


# ---------------------------------------------------------------------------
# Wrapper
# ---------------------------------------------------------------------------
@jax.jit
def vae_solver_forward(params, context, solution, key):
    """Equivalent of VAE_Solver.forward(context, solution, cfg, teacher_forcing=True)."""
    f32 = jnp.float32
    ctx_feat = context[:, :-1].astype(f32)        # glue: drop last context column
    sol = solution.astype(f32)
    B, NV = sol.shape
    C = ctx_feat.shape[1]
    E = EMBED_DIM
    L = LATENT_SIZE
    OUT = OUTPUT_DIM + 1

    eps = jax.random.normal(key, (B, L), f32)      # reparameterisation noise

    # ---- data slab: [sol_steps | sol | ctx | eps], rows = NV*B ----
    sol_steps = jnp.reshape(jnp.transpose(sol), (NV * B, 1))   # step-major column
    data = jnp.zeros((NV * B, 1 + NV + C + L), f32)
    data = data.at[:, 0:1].set(sol_steps)
    data = data.at[0:B, 1:1 + NV].set(sol)
    data = data.at[0:B, 1 + NV:1 + NV + C].set(ctx_feat)
    data = data.at[0:B, 1 + NV + C:1 + NV + C + L].set(eps)

    # ---- weight / bias slabs (constant-shaped glue, built once per call) ----
    def zE(r):
        return jnp.zeros((r, E), f32)

    w_blocks = {
        "w_enc_in": jnp.concatenate(
            [jnp.concatenate([params["ws"], zE(NV)], axis=1),
             jnp.concatenate([zE(C), params["wce"]], axis=1)], axis=0),
        "wee": params["wee"],
        "w_head": jnp.concatenate([params["wmu"], params["wsig"]], axis=1),
        "w_dec_top": jnp.concatenate([params["wcd"], zE(C)], axis=1),
        "w_dec_bot": jnp.concatenate([zE(L), params["wl"]], axis=1),
        "wed": params["wed"],
        "wa": params["wa"],
        "wi_cat": jnp.concatenate([params["wir"], params["wiz"], params["win"]], axis=1),
        "wh_cat": jnp.concatenate([params["whr"], params["whz"], params["whn"]], axis=1),
        "wro": params["wro"],
    }
    w_slab = jnp.zeros((_W_ROWS, _W_COLS), f32)
    for name, (r, off, c) in _W_LAYOUT.items():
        w_slab = w_slab.at[0:r, off:off + c].set(w_blocks[name])

    b_blocks = {
        "b_enc_in": jnp.concatenate([params["bs"], params["bce"]], axis=1),
        "bee": params["bee"],
        "b_head": jnp.concatenate([params["bmu"], params["bsig"]], axis=1),
        "b_dec_in": jnp.concatenate([params["bcd"], params["bl"]], axis=1),
        "bed": params["bed"],
        "ba": params["ba"],
        "bi_cat": jnp.concatenate([params["bir"], params["biz"], params["bin"]], axis=1),
        "bh_cat": jnp.concatenate([params["bhr"], params["bhz"], params["bhn"]], axis=1),
        "bro": params["bro"],
    }
    b_slab = jnp.zeros((1, _B_COLS), f32)
    for name, (off, c) in _B_LAYOUT.items():
        b_slab = b_slab.at[:, off:off + c].set(b_blocks[name])

    inputs = [data, w_slab, b_slab]

    # Advisory cost hint (pure-Python ints only; previous jnp-based version
    # leaked a tracer into int() and crashed tracing).
    flops = (2 * B * ((NV + C) * 2 * E + 2 * E * E + E * 2 * L
                      + C * 2 * E + L * 2 * E + 2 * E * E
                      + NV * E * 3 * E + NV * E * OUT)
             + 2 * NV * B * (E + E * 3 * E))
    transcendentals = B * NV * (OUT + 3 * E + 2) + B * L
    bytes_accessed = 4 * (NV * B * (1 + NV + C + L)
                          + _W_ROWS * _W_COLS + _B_COLS + B * OUT_LANES)

    out = pl.pallas_call(
        _vae_kernel,
        out_shape=jax.ShapeDtypeStruct((B, OUT_LANES), f32),
        grid=(1,),
        in_specs=[pl.BlockSpec(a.shape, lambda i, _nd=a.ndim: (0,) * _nd)
                  for a in inputs],
        out_specs=pl.BlockSpec((B, OUT_LANES), lambda i: (0, 0)),
        compiler_params=pltpu.CompilerParams(
            # NOTE: tile B on the grid with "parallel" for large batches
            # (engages v7x's second TensorCore); at B=2 keep one step.
            dimension_semantics=("arbitrary",)),
        cost_estimate=pl.CostEstimate(flops=flops,
                                      transcendentals=transcendentals,
                                      bytes_accessed=bytes_accessed),
    )(*inputs)

    mu = out[:, 0:L]
    log_var = out[:, L:2 * L]
    z = out[:, 2 * L:3 * L]
    z_logp = out[:, 3 * L]
    tour_logp = out[:, 3 * L + 1:3 * L + 2]

    # decoded solution: pure function of the teacher-forced input (moved out
    # of the kernel) = cat_to_cont(cont_to_cat(solution)) in reversed step order
    cat = jnp.clip(((sol + 1.0) * (OUTPUT_DIM / 2.0)).astype(jnp.int32), 0, OUTPUT_DIM)
    decoded = (-1.0 + cat.astype(f32) * (2.0 / OUTPUT_DIM))[:, ::-1]

    return decoded, tour_logp, mu, log_var, z, z_logp


# ---------------------------------------------------------------------------
# Deterministic parameter init (PyTorch-style uniform fan-in scaling)
# ---------------------------------------------------------------------------
def init_params(key, num_var=NUM_VAR, deg=DEG, latent_size=LATENT_SIZE,
                embed_dim=EMBED_DIM):
    C = num_var * deg
    E = embed_dim
    L = latent_size
    OUT = OUTPUT_DIM + 1

    def lin(k, fan_in, shape):
        a = 1.0 / jnp.sqrt(jnp.float32(fan_in))
        return jax.random.uniform(k, shape, jnp.float32, -a, a)

    keys = jax.random.split(key, 34)
    k = iter(range(34))
    p = {
        # ---- Encoder ----
        "ws": lin(keys[next(k)], num_var, (num_var, E)), "bs": lin(keys[next(k)], num_var, (1, E)),
        "wce": lin(keys[next(k)], C, (C, E)), "bce": lin(keys[next(k)], C, (1, E)),
        "wee": lin(keys[next(k)], 2 * E, (2 * E, E)), "bee": lin(keys[next(k)], 2 * E, (1, E)),
        "wmu": lin(keys[next(k)], E, (E, L)), "bmu": lin(keys[next(k)], E, (1, L)),
        "wsig": lin(keys[next(k)], E, (E, L)), "bsig": lin(keys[next(k)], E, (1, L)),
        # ---- Decoder ----
        "wcd": lin(keys[next(k)], C, (C, E)), "bcd": lin(keys[next(k)], C, (1, E)),
        "wl": lin(keys[next(k)], L, (L, E)), "bl": lin(keys[next(k)], L, (1, E)),
        "wed": lin(keys[next(k)], 2 * E, (2 * E, E)), "bed": lin(keys[next(k)], 2 * E, (1, E)),
        "wa": lin(keys[next(k)], 1, (1, E)), "ba": lin(keys[next(k)], 1, (1, E)),
        "wro": lin(keys[next(k)], E, (E, OUT)), "bro": lin(keys[next(k)], E, (1, OUT)),
        # GRUCell(E, E), split r/z/n
        "wir": lin(keys[next(k)], E, (E, E)), "wiz": lin(keys[next(k)], E, (E, E)),
        "win": lin(keys[next(k)], E, (E, E)),
        "bir": lin(keys[next(k)], E, (1, E)), "biz": lin(keys[next(k)], E, (1, E)),
        "bin": lin(keys[next(k)], E, (1, E)),
        "whr": lin(keys[next(k)], E, (E, E)), "whz": lin(keys[next(k)], E, (E, E)),
        "whn": lin(keys[next(k)], E, (E, E)),
        "bhr": lin(keys[next(k)], E, (1, E)), "bhz": lin(keys[next(k)], E, (1, E)),
        "bhn": lin(keys[next(k)], E, (1, E)),
    }
    return p


if __name__ == "__main__":
    key = jax.random.PRNGKey(0)
    kp, kc, ks, ke = jax.random.split(key, 4)

    params = init_params(kp)

    B = 2
    C = NUM_VAR * DEG
    # context has num_var*deg + 1 columns (last one is dropped by the model)
    context = jax.random.uniform(kc, (B, C + 1), jnp.float32, -1.0, 1.0)
    # solution in [-1, 1]
    solution = jax.random.uniform(ks, (B, NUM_VAR), jnp.float32, -1.0, 1.0)

    outs = vae_solver_forward(params, context, solution, ke)
    jax.block_until_ready(outs)
    decoded_solution, tour_logp, mu, log_var, Z, Z_logp = outs

    assert decoded_solution.shape == (B, NUM_VAR)
    assert tour_logp.shape == (B, 1)
    assert mu.shape == (B, LATENT_SIZE)
    assert log_var.shape == (B, LATENT_SIZE)
    assert Z.shape == (B, LATENT_SIZE)
    assert Z_logp.shape == (B,)
    print("KERNEL_OK")
</pallas_src>

<mosaic_0001>
module attributes {stable_mosaic.version = 11 : i64} {
  func.func @_vae_kernel(%arg0: i32, %arg1: memref<16x35xf32, #tpu.memory_space<vmem>>, %arg2: memref<64x525xf32, #tpu.memory_space<vmem>>, %arg3: memref<1x461xf32, #tpu.memory_space<vmem>>, %arg4: memref<2x128xf32, #tpu.memory_space<vmem>>) attributes {dimension_semantics = [#tpu.dimension_semantics<arbitrary>], iteration_bounds = array<i64: 1>, scalar_prefetch = 0 : i64, scratch_operands = 0 : i64, tpu.core_type = #tpu.core_type<tc>, window_params = [{pipeline_mode = #tpu.pipeline_mode<synchronous>, transform_indices = @transform_0, window_bounds = array<i64: 16, 35>}, {pipeline_mode = #tpu.pipeline_mode<synchronous>, transform_indices = @transform_1, window_bounds = array<i64: 64, 525>}, {pipeline_mode = #tpu.pipeline_mode<synchronous>, transform_indices = @transform_2, window_bounds = array<i64: 1, 461>}, {pipeline_mode = #tpu.pipeline_mode<synchronous>, transform_indices = @transform_3, window_bounds = array<i64: 2, 128>}]} {
    %c0 = arith.constant 0 : index
    %c0_0 = arith.constant 0 : index
    %0 = vector.load %arg1[%c0, %c0_0] : memref<16x35xf32, #tpu.memory_space<vmem>>, vector<16x1xf32>
    %c0_1 = arith.constant 0 : index
    %c1 = arith.constant 1 : index
    %1 = vector.load %arg1[%c0_1, %c1] : memref<16x35xf32, #tpu.memory_space<vmem>>, vector<2x8xf32>
    %c0_2 = arith.constant 0 : index
    %c1_3 = arith.constant 1 : index
    %2 = vector.load %arg1[%c0_2, %c1_3] : memref<16x35xf32, #tpu.memory_space<vmem>>, vector<2x32xf32>
    %c0_4 = arith.constant 0 : index
    %c9 = arith.constant 9 : index
    %3 = vector.load %arg1[%c0_4, %c9] : memref<16x35xf32, #tpu.memory_space<vmem>>, vector<2x24xf32>
    %c0_5 = arith.constant 0 : index
    %c33 = arith.constant 33 : index
    %4 = vector.load %arg1[%c0_5, %c33] : memref<16x35xf32, #tpu.memory_space<vmem>>, vector<2x2xf32>
    %c0_6 = arith.constant 0 : index
    %c0_7 = arith.constant 0 : index
    %5 = vector.load %arg2[%c0_6, %c0_7] : memref<64x525xf32, #tpu.memory_space<vmem>>, vector<32x64xf32>
    %cst = arith.constant dense<0.000000e+00> : vector<2x64xf32>
    %6 = tpu.matmul %2, %5, %cst {dimension_numbers = #tpu.dot_dimension_numbers<[1], [0], [0], [1], [0, 0, 1, 1], [], []>} : vector<2x32xf32>, vector<32x64xf32>, vector<2x64xf32> -> vector<2x64xf32>
    %c0_8 = arith.constant 0 : index
    %c0_9 = arith.constant 0 : index
    %7 = vector.load %arg3[%c0_8, %c0_9] : memref<1x461xf32, #tpu.memory_space<vmem>>, vector<1x64xf32>
    %8 = vector.broadcast %7 : vector<1x64xf32> to vector<2x64xf32>
    %9 = arith.addf %6, %8 : vector<2x64xf32>
    %cst_10 = arith.constant 0.000000e+00 : f32
    %10 = vector.broadcast %cst_10 : f32 to vector<2x64xf32>
    %11 = arith.maximumf %9, %10 : vector<2x64xf32>
    %c0_11 = arith.constant 0 : index
    %c64 = arith.constant 64 : index
    %12 = vector.load %arg2[%c0_11, %c64] : memref<64x525xf32, #tpu.memory_space<vmem>>, vector<64x32xf32>
    %cst_12 = arith.constant dense<0.000000e+00> : vector<2x32xf32>
    %13 = tpu.matmul %11, %12, %cst_12 {dimension_numbers = #tpu.dot_dimension_numbers<[1], [0], [0], [1], [0, 0, 1, 1], [], []>} : vector<2x64xf32>, vector<64x32xf32>, vector<2x32xf32> -> vector<2x32xf32>
    %c0_13 = arith.constant 0 : index
    %c64_14 = arith.constant 64 : index
    %14 = vector.load %arg3[%c0_13, %c64_14] : memref<1x461xf32, #tpu.memory_space<vmem>>, vector<1x32xf32>
    %15 = vector.broadcast %14 : vector<1x32xf32> to vector<2x32xf32>
    %16 = arith.addf %13, %15 : vector<2x32xf32>
    %cst_15 = arith.constant 0.000000e+00 : f32
    %17 = vector.broadcast %cst_15 : f32 to vector<2x32xf32>
    %18 = arith.maximumf %16, %17 : vector<2x32xf32>
    %c0_16 = arith.constant 0 : index
    %c96 = arith.constant 96 : index
    %19 = vector.load %arg2[%c0_16, %c96] : memref<64x525xf32, #tpu.memory_space<vmem>>, vector<32x4xf32>
    %cst_17 = arith.constant dense<0.000000e+00> : vector<2x4xf32>
    %20 = tpu.matmul %18, %19, %cst_17 {dimension_numbers = #tpu.dot_dimension_numbers<[1], [0], [0], [1], [0, 0, 1, 1], [], []>} : vector<2x32xf32>, vector<32x4xf32>, vector<2x4xf32> -> vector<2x4xf32>
    %c0_18 = arith.constant 0 : index
    %c96_19 = arith.constant 96 : index
    %21 = vector.load %arg3[%c0_18, %c96_19] : memref<1x461xf32, #tpu.memory_space<vmem>>, vector<1x4xf32>
    %22 = vector.broadcast %21 : vector<1x4xf32> to vector<2x4xf32>
    %23 = arith.addf %20, %22 : vector<2x4xf32>
    %24 = vector.extract_strided_slice %23 {offsets = [0, 0], sizes = [2, 2], strides = [1, 1]} : vector<2x4xf32> to vector<2x2xf32>
    %25 = vector.extract_strided_slice %23 {offsets = [0, 2], sizes = [2, 2], strides = [1, 1]} : vector<2x4xf32> to vector<2x2xf32>
    %cst_20 = arith.constant 5.000000e-01 : f32
    %26 = vector.broadcast %cst_20 : f32 to vector<2x2xf32>
    %27 = arith.mulf %26, %25 : vector<2x2xf32>
    %28 = math.exp %27 : vector<2x2xf32>
    %29 = arith.mulf %4, %28 : vector<2x2xf32>
    %30 = arith.addf %24, %29 : vector<2x2xf32>
    %cst_21 = arith.constant -5.000000e-01 : f32
    %31 = vector.broadcast %cst_21 : f32 to vector<2x2xf32>
    %32 = arith.mulf %31, %4 : vector<2x2xf32>
    %33 = arith.mulf %32, %4 : vector<2x2xf32>
    %cst_22 = arith.constant 5.000000e-01 : f32
    %34 = vector.broadcast %cst_22 : f32 to vector<2x2xf32>
    %35 = arith.mulf %34, %25 : vector<2x2xf32>
    %36 = arith.subf %33, %35 : vector<2x2xf32>
    %cst_23 = arith.constant 0.918938517 : f32
    %37 = vector.broadcast %cst_23 : f32 to vector<2x2xf32>
    %38 = arith.subf %36, %37 : vector<2x2xf32>
    %cst_24 = arith.constant dense<0.000000e+00> : vector<2xf32>
    %39 = vector.multi_reduction <add>, %38, %cst_24 [1] : vector<2x2xf32> to vector<2xf32>
    %40 = vector.shape_cast %39 : vector<2xf32> to vector<2x1xf32>
    %c0_25 = arith.constant 0 : index
    %c100 = arith.constant 100 : index
    %41 = vector.load %arg2[%c0_25, %c100] : memref<64x525xf32, #tpu.memory_space<vmem>>, vector<24x64xf32>
    %cst_26 = arith.constant dense<0.000000e+00> : vector<2x64xf32>
    %42 = tpu.matmul %3, %41, %cst_26 {dimension_numbers = #tpu.dot_dimension_numbers<[1], [0], [0], [1], [0, 0, 1, 1], [], []>} : vector<2x24xf32>, vector<24x64xf32>, vector<2x64xf32> -> vector<2x64xf32>
    %c0_27 = arith.constant 0 : index
    %c164 = arith.constant 164 : index
    %43 = vector.load %arg2[%c0_27, %c164] : memref<64x525xf32, #tpu.memory_space<vmem>>, vector<2x64xf32>
    %cst_28 = arith.constant dense<0.000000e+00> : vector<2x64xf32>
    %44 = tpu.matmul %30, %43, %cst_28 {dimension_numbers = #tpu.dot_dimension_numbers<[1], [0], [0], [1], [0, 0, 1, 1], [], []>} : vector<2x2xf32>, vector<2x64xf32>, vector<2x64xf32> -> vector<2x64xf32>
    %45 = arith.addf %42, %44 : vector<2x64xf32>
    %c0_29 = arith.constant 0 : index
    %c100_30 = arith.constant 100 : index
    %46 = vector.load %arg3[%c0_29, %c100_30] : memref<1x461xf32, #tpu.memory_space<vmem>>, vector<1x64xf32>
    %47 = vector.broadcast %46 : vector<1x64xf32> to vector<2x64xf32>
    %48 = arith.addf %45, %47 : vector<2x64xf32>
    %cst_31 = arith.constant 0.000000e+00 : f32
    %49 = vector.broadcast %cst_31 : f32 to vector<2x64xf32>
    %50 = arith.maximumf %48, %49 : vector<2x64xf32>
    %c0_32 = arith.constant 0 : index
    %c228 = arith.constant 228 : index
    %51 = vector.load %arg2[%c0_32, %c228] : memref<64x525xf32, #tpu.memory_space<vmem>>, vector<64x32xf32>
    %cst_33 = arith.constant dense<0.000000e+00> : vector<2x32xf32>
    %52 = tpu.matmul %50, %51, %cst_33 {dimension_numbers = #tpu.dot_dimension_numbers<[1], [0], [0], [1], [0, 0, 1, 1], [], []>} : vector<2x64xf32>, vector<64x32xf32>, vector<2x32xf32> -> vector<2x32xf32>
    %c0_34 = arith.constant 0 : index
    %c164_35 = arith.constant 164 : index
    %53 = vector.load %arg3[%c0_34, %c164_35] : memref<1x461xf32, #tpu.memory_space<vmem>>, vector<1x32xf32>
    %54 = vector.broadcast %53 : vector<1x32xf32> to vector<2x32xf32>
    %55 = arith.addf %52, %54 : vector<2x32xf32>
    %cst_36 = arith.constant 0.000000e+00 : f32
    %56 = vector.broadcast %cst_36 : f32 to vector<2x32xf32>
    %57 = arith.maximumf %55, %56 : vector<2x32xf32>
    %cst_37 = arith.constant 1.000000e+00 : f32
    %58 = vector.broadcast %cst_37 : f32 to vector<16x1xf32>
    %59 = arith.addf %0, %58 : vector<16x1xf32>
    %cst_38 = arith.constant 2.000000e+01 : f32
    %60 = vector.broadcast %cst_38 : f32 to vector<16x1xf32>
    %61 = arith.mulf %59, %60 : vector<16x1xf32>
    %62 = arith.fptosi %61 : vector<16x1xf32> to vector<16x1xi32>
    %c0_i32 = arith.constant 0 : i32
    %c40_i32 = arith.constant 40 : i32
    %63 = vector.broadcast %c0_i32 : i32 to vector<16x1xi32>
    %64 = arith.maxsi %63, %62 : vector<16x1xi32>
    %65 = vector.broadcast %c40_i32 : i32 to vector<16x1xi32>
    %66 = arith.minsi %65, %64 : vector<16x1xi32>
    %67 = arith.sitofp %66 : vector<16x1xi32> to vector<16x1xf32>
    %cst_39 = arith.constant 5.000000e-02 : f32
    %68 = vector.broadcast %cst_39 : f32 to vector<16x1xf32>
    %69 = arith.mulf %67, %68 : vector<16x1xf32>
    %cst_40 = arith.constant -1.000000e+00 : f32
    %70 = vector.broadcast %cst_40 : f32 to vector<16x1xf32>
    %71 = arith.addf %70, %69 : vector<16x1xf32>
    %c0_41 = arith.constant 0 : index
    %c260 = arith.constant 260 : index
    %72 = vector.load %arg2[%c0_41, %c260] : memref<64x525xf32, #tpu.memory_space<vmem>>, vector<1x32xf32>
    %73 = vector.broadcast %71 : vector<16x1xf32> to vector<16x32xf32>
    %74 = vector.broadcast %72 : vector<1x32xf32> to vector<16x32xf32>
    %75 = arith.mulf %73, %74 : vector<16x32xf32>
    %c0_42 = arith.constant 0 : index
    %c196 = arith.constant 196 : index
    %76 = vector.load %arg3[%c0_42, %c196] : memref<1x461xf32, #tpu.memory_space<vmem>>, vector<1x32xf32>
    %77 = vector.broadcast %76 : vector<1x32xf32> to vector<16x32xf32>
    %78 = arith.addf %75, %77 : vector<16x32xf32>
    %cst_43 = arith.constant 0.000000e+00 : f32
    %79 = vector.broadcast %cst_43 : f32 to vector<16x32xf32>
    %80 = arith.maximumf %78, %79 : vector<16x32xf32>
    %c0_44 = arith.constant 0 : index
    %c292 = arith.constant 292 : index
    %81 = vector.load %arg2[%c0_44, %c292] : memref<64x525xf32, #tpu.memory_space<vmem>>, vector<32x96xf32>
    %cst_45 = arith.constant dense<0.000000e+00> : vector<16x96xf32>
    %82 = tpu.matmul %80, %81, %cst_45 {dimension_numbers = #tpu.dot_dimension_numbers<[1], [0], [0], [1], [0, 0, 1, 1], [], []>} : vector<16x32xf32>, vector<32x96xf32>, vector<16x96xf32> -> vector<16x96xf32>
    %c0_46 = arith.constant 0 : index
    %c228_47 = arith.constant 228 : index
    %83 = vector.load %arg3[%c0_46, %c228_47] : memref<1x461xf32, #tpu.memory_space<vmem>>, vector<1x96xf32>
    %84 = vector.broadcast %83 : vector<1x96xf32> to vector<16x96xf32>
    %85 = arith.addf %82, %84 : vector<16x96xf32>
    %cst_48 = arith.constant 1.000000e+00 : f32
    %86 = vector.broadcast %cst_48 : f32 to vector<2x8xf32>
    %87 = arith.addf %1, %86 : vector<2x8xf32>
    %cst_49 = arith.constant 2.000000e+01 : f32
    %88 = vector.broadcast %cst_49 : f32 to vector<2x8xf32>
    %89 = arith.mulf %87, %88 : vector<2x8xf32>
    %90 = arith.fptosi %89 : vector<2x8xf32> to vector<2x8xi32>
    %c0_i32_50 = arith.constant 0 : i32
    %c40_i32_51 = arith.constant 40 : i32
    %91 = vector.broadcast %c0_i32_50 : i32 to vector<2x8xi32>
    %92 = arith.maxsi %91, %90 : vector<2x8xi32>
    %93 = vector.broadcast %c40_i32_51 : i32 to vector<2x8xi32>
    %94 = arith.minsi %93, %92 : vector<2x8xi32>
    %c0_52 = arith.constant 0 : index
    %c388 = arith.constant 388 : index
    %95 = vector.load %arg2[%c0_52, %c388] : memref<64x525xf32, #tpu.memory_space<vmem>>, vector<32x96xf32>
    %c0_53 = arith.constant 0 : index
    %c324 = arith.constant 324 : index
    %96 = vector.load %arg3[%c0_53, %c324] : memref<1x461xf32, #tpu.memory_space<vmem>>, vector<1x96xf32>
    %cst_54 = arith.constant dense<0.000000e+00> : vector<2x96xf32>
    %97 = tpu.matmul %57, %95, %cst_54 {dimension_numbers = #tpu.dot_dimension_numbers<[1], [0], [0], [1], [0, 0, 1, 1], [], []>} : vector<2x32xf32>, vector<32x96xf32>, vector<2x96xf32> -> vector<2x96xf32>
    %98 = vector.broadcast %96 : vector<1x96xf32> to vector<2x96xf32>
    %99 = arith.addf %97, %98 : vector<2x96xf32>
    %100 = vector.extract_strided_slice %85 {offsets = [0, 0], sizes = [2, 96], strides = [1, 1]} : vector<16x96xf32> to vector<2x96xf32>
    %101 = vector.extract_strided_slice %100 {offsets = [0, 0], sizes = [2, 32], strides = [1, 1]} : vector<2x96xf32> to vector<2x32xf32>
    %102 = vector.extract_strided_slice %99 {offsets = [0, 0], sizes = [2, 32], strides = [1, 1]} : vector<2x96xf32> to vector<2x32xf32>
    %103 = arith.addf %101, %102 : vector<2x32xf32>
    %cst_55 = arith.constant 0.000000e+00 : f32
    %104 = vector.broadcast %cst_55 : f32 to vector<2x32xf32>
    %105 = arith.subf %104, %103 : vector<2x32xf32>
    %106 = math.exp %105 : vector<2x32xf32>
    %cst_56 = arith.constant 1.000000e+00 : f32
    %107 = vector.broadcast %cst_56 : f32 to vector<2x32xf32>
    %108 = arith.addf %107, %106 : vector<2x32xf32>
    %cst_57 = arith.constant 1.000000e+00 : f32
    %109 = vector.broadcast %cst_57 : f32 to vector<2x32xf32>
    %110 = arith.divf %109, %108 : vector<2x32xf32>
    %111 = vector.extract_strided_slice %100 {offsets = [0, 32], sizes = [2, 32], strides = [1, 1]} : vector<2x96xf32> to vector<2x32xf32>
    %112 = vector.extract_strided_slice %99 {offsets = [0, 32], sizes = [2, 32], strides = [1, 1]} : vector<2x96xf32> to vector<2x32xf32>
    %113 = arith.addf %111, %112 : vector<2x32xf32>
    %cst_58 = arith.constant 0.000000e+00 : f32
    %114 = vector.broadcast %cst_58 : f32 to vector<2x32xf32>
    %115 = arith.subf %114, %113 : vector<2x32xf32>
    %116 = math.exp %115 : vector<2x32xf32>
    %cst_59 = arith.constant 1.000000e+00 : f32
    %117 = vector.broadcast %cst_59 : f32 to vector<2x32xf32>
    %118 = arith.addf %117, %116 : vector<2x32xf32>
    %cst_60 = arith.constant 1.000000e+00 : f32
    %119 = vector.broadcast %cst_60 : f32 to vector<2x32xf32>
    %120 = arith.divf %119, %118 : vector<2x32xf32>
    %121 = vector.extract_strided_slice %100 {offsets = [0, 64], sizes = [2, 32], strides = [1, 1]} : vector<2x96xf32> to vector<2x32xf32>
    %122 = vector.extract_strided_slice %99 {offsets = [0, 64], sizes = [2, 32], strides = [1, 1]} : vector<2x96xf32> to vector<2x32xf32>
    %123 = arith.mulf %110, %122 : vector<2x32xf32>
    %124 = arith.addf %121, %123 : vector<2x32xf32>
    %125 = math.tanh %124 : vector<2x32xf32>
    %cst_61 = arith.constant 1.000000e+00 : f32
    %126 = vector.broadcast %cst_61 : f32 to vector<2x32xf32>
    %127 = arith.subf %126, %120 : vector<2x32xf32>
    %128 = arith.mulf %127, %125 : vector<2x32xf32>
    %129 = arith.mulf %120, %57 : vector<2x32xf32>
    %130 = arith.addf %128, %129 : vector<2x32xf32>
    %cst_62 = arith.constant dense<0.000000e+00> : vector<2x96xf32>
    %131 = tpu.matmul %130, %95, %cst_62 {dimension_numbers = #tpu.dot_dimension_numbers<[1], [0], [0], [1], [0, 0, 1, 1], [], []>} : vector<2x32xf32>, vector<32x96xf32>, vector<2x96xf32> -> vector<2x96xf32>
    %132 = vector.broadcast %96 : vector<1x96xf32> to vector<2x96xf32>
    %133 = arith.addf %131, %132 : vector<2x96xf32>
    %134 = vector.extract_strided_slice %85 {offsets = [2, 0], sizes = [2, 96], strides = [1, 1]} : vector<16x96xf32> to vector<2x96xf32>
    %135 = vector.extract_strided_slice %134 {offsets = [0, 0], sizes = [2, 32], strides = [1, 1]} : vector<2x96xf32> to vector<2x32xf32>
    %136 = vector.extract_strided_slice %133 {offsets = [0, 0], sizes = [2, 32], strides = [1, 1]} : vector<2x96xf32> to vector<2x32xf32>
    %137 = arith.addf %135, %136 : vector<2x32xf32>
    %cst_63 = arith.constant 0.000000e+00 : f32
    %138 = vector.broadcast %cst_63 : f32 to vector<2x32xf32>
    %139 = arith.subf %138, %137 : vector<2x32xf32>
    %140 = math.exp %139 : vector<2x32xf32>
    %cst_64 = arith.constant 1.000000e+00 : f32
    %141 = vector.broadcast %cst_64 : f32 to vector<2x32xf32>
    %142 = arith.addf %141, %140 : vector<2x32xf32>
    %cst_65 = arith.constant 1.000000e+00 : f32
    %143 = vector.broadcast %cst_65 : f32 to vector<2x32xf32>
    %144 = arith.divf %143, %142 : vector<2x32xf32>
    %145 = vector.extract_strided_slice %134 {offsets = [0, 32], sizes = [2, 32], strides = [1, 1]} : vector<2x96xf32> to vector<2x32xf32>
    %146 = vector.extract_strided_slice %133 {offsets = [0, 32], sizes = [2, 32], strides = [1, 1]} : vector<2x96xf32> to vector<2x32xf32>
    %147 = arith.addf %145, %146 : vector<2x32xf32>
    %cst_66 = arith.constant 0.000000e+00 : f32
    %148 = vector.broadcast %cst_66 : f32 to vector<2x32xf32>
    %149 = arith.subf %148, %147 : vector<2x32xf32>
    %150 = math.exp %149 : vector<2x32xf32>
    %cst_67 = arith.constant 1.000000e+00 : f32
    %151 = vector.broadcast %cst_67 : f32 to vector<2x32xf32>
    %152 = arith.addf %151, %150 : vector<2x32xf32>
    %cst_68 = arith.constant 1.000000e+00 : f32
    %153 = vector.broadcast %cst_68 : f32 to vector<2x32xf32>
    %154 = arith.divf %153, %152 : vector<2x32xf32>
    %155 = vector.extract_strided_slice %134 {offsets = [0, 64], sizes = [2, 32], strides = [1, 1]} : vector<2x96xf32> to vector<2x32xf32>
    %156 = vector.extract_strided_slice %133 {offsets = [0, 64], sizes = [2, 32], strides = [1, 1]} : vector<2x96xf32> to vector<2x32xf32>
    %157 = arith.mulf %144, %156 : vector<2x32xf32>
    %158 = arith.addf %155, %157 : vector<2x32xf32>
    %159 = math.tanh %158 : vector<2x32xf32>
    %cst_69 = arith.constant 1.000000e+00 : f32
    %160 = vector.broadcast %cst_69 : f32 to vector<2x32xf32>
    %161 = arith.subf %160, %154 : vector<2x32xf32>
    %162 = arith.mulf %161, %159 : vector<2x32xf32>
    %163 = arith.mulf %154, %130 : vector<2x32xf32>
    %164 = arith.addf %162, %163 : vector<2x32xf32>
    %cst_70 = arith.constant dense<0.000000e+00> : vector<2x96xf32>
    %165 = tpu.matmul %164, %95, %cst_70 {dimension_numbers = #tpu.dot_dimension_numbers<[1], [0], [0], [1], [0, 0, 1, 1], [], []>} : vector<2x32xf32>, vector<32x96xf32>, vector<2x96xf32> -> vector<2x96xf32>
    %166 = vector.broadcast %96 : vector<1x96xf32> to vector<2x96xf32>
    %167 = arith.addf %165, %166 : vector<2x96xf32>
    %168 = vector.extract_strided_slice %85 {offsets = [4, 0], sizes = [2, 96], strides = [1, 1]} : vector<16x96xf32> to vector<2x96xf32>
    %169 = vector.extract_strided_slice %168 {offsets = [0, 0], sizes = [2, 32], strides = [1, 1]} : vector<2x96xf32> to vector<2x32xf32>
    %170 = vector.extract_strided_slice %167 {offsets = [0, 0], sizes = [2, 32], strides = [1, 1]} : vector<2x96xf32> to vector<2x32xf32>
    %171 = arith.addf %169, %170 : vector<2x32xf32>
    %cst_71 = arith.constant 0.000000e+00 : f32
    %172 = vector.broadcast %cst_71 : f32 to vector<2x32xf32>
    %173 = arith.subf %172, %171 : vector<2x32xf32>
    %174 = math.exp %173 : vector<2x32xf32>
    %cst_72 = arith.constant 1.000000e+00 : f32
    %175 = vector.broadcast %cst_72 : f32 to vector<2x32xf32>
    %176 = arith.addf %175, %174 : vector<2x32xf32>
    %cst_73 = arith.constant 1.000000e+00 : f32
    %177 = vector.broadcast %cst_73 : f32 to vector<2x32xf32>
    %178 = arith.divf %177, %176 : vector<2x32xf32>
    %179 = vector.extract_strided_slice %168 {offsets = [0, 32], sizes = [2, 32], strides = [1, 1]} : vector<2x96xf32> to vector<2x32xf32>
    %180 = vector.extract_strided_slice %167 {offsets = [0, 32], sizes = [2, 32], strides = [1, 1]} : vector<2x96xf32> to vector<2x32xf32>
    %181 = arith.addf %179, %180 : vector<2x32xf32>
    %cst_74 = arith.constant 0.000000e+00 : f32
    %182 = vector.broadcast %cst_74 : f32 to vector<2x32xf32>
    %183 = arith.subf %182, %181 : vector<2x32xf32>
    %184 = math.exp %183 : vector<2x32xf32>
    %cst_75 = arith.constant 1.000000e+00 : f32
    %185 = vector.broadcast %cst_75 : f32 to vector<2x32xf32>
    %186 = arith.addf %185, %184 : vector<2x32xf32>
    %cst_76 = arith.constant 1.000000e+00 : f32
    %187 = vector.broadcast %cst_76 : f32 to vector<2x32xf32>
    %188 = arith.divf %187, %186 : vector<2x32xf32>
    %189 = vector.extract_strided_slice %168 {offsets = [0, 64], sizes = [2, 32], strides = [1, 1]} : vector<2x96xf32> to vector<2x32xf32>
    %190 = vector.extract_strided_slice %167 {offsets = [0, 64], sizes = [2, 32], strides = [1, 1]} : vector<2x96xf32> to vector<2x32xf32>
    %191 = arith.mulf %178, %190 : vector<2x32xf32>
    %192 = arith.addf %189, %191 : vector<2x32xf32>
    %193 = math.tanh %192 : vector<2x32xf32>
    %cst_77 = arith.constant 1.000000e+00 : f32
    %194 = vector.broadcast %cst_77 : f32 to vector<2x32xf32>
    %195 = arith.subf %194, %188 : vector<2x32xf32>
    %196 = arith.mulf %195, %193 : vector<2x32xf32>
    %197 = arith.mulf %188, %164 : vector<2x32xf32>
    %198 = arith.addf %196, %197 : vector<2x32xf32>
    %cst_78 = arith.constant dense<0.000000e+00> : vector<2x96xf32>
    %199 = tpu.matmul %198, %95, %cst_78 {dimension_numbers = #tpu.dot_dimension_numbers<[1], [0], [0], [1], [0, 0, 1, 1], [], []>} : vector<2x32xf32>, vector<32x96xf32>, vector<2x96xf32> -> vector<2x96xf32>
    %200 = vector.broadcast %96 : vector<1x96xf32> to vector<2x96xf32>
    %201 = arith.addf %199, %200 : vector<2x96xf32>
    %202 = vector.extract_strided_slice %85 {offsets = [6, 0], sizes = [2, 96], strides = [1, 1]} : vector<16x96xf32> to vector<2x96xf32>
    %203 = vector.extract_strided_slice %202 {offsets = [0, 0], sizes = [2, 32], strides = [1, 1]} : vector<2x96xf32> to vector<2x32xf32>
    %204 = vector.extract_strided_slice %201 {offsets = [0, 0], sizes = [2, 32], strides = [1, 1]} : vector<2x96xf32> to vector<2x32xf32>
    %205 = arith.addf %203, %204 : vector<2x32xf32>
    %cst_79 = arith.constant 0.000000e+00 : f32
    %206 = vector.broadcast %cst_79 : f32 to vector<2x32xf32>
    %207 = arith.subf %206, %205 : vector<2x32xf32>
    %208 = math.exp %207 : vector<2x32xf32>
    %cst_80 = arith.constant 1.000000e+00 : f32
    %209 = vector.broadcast %cst_80 : f32 to vector<2x32xf32>
    %210 = arith.addf %209, %208 : vector<2x32xf32>
    %cst_81 = arith.constant 1.000000e+00 : f32
    %211 = vector.broadcast %cst_81 : f32 to vector<2x32xf32>
    %212 = arith.divf %211, %210 : vector<2x32xf32>
    %213 = vector.extract_strided_slice %202 {offsets = [0, 32], sizes = [2, 32], strides = [1, 1]} : vector<2x96xf32> to vector<2x32xf32>
    %214 = vector.extract_strided_slice %201 {offsets = [0, 32], sizes = [2, 32], strides = [1, 1]} : vector<2x96xf32> to vector<2x32xf32>
    %215 = arith.addf %213, %214 : vector<2x32xf32>
    %cst_82 = arith.constant 0.000000e+00 : f32
    %216 = vector.broadcast %cst_82 : f32 to vector<2x32xf32>
    %217 = arith.subf %216, %215 : vector<2x32xf32>
    %218 = math.exp %217 : vector<2x32xf32>
    %cst_83 = arith.constant 1.000000e+00 : f32
    %219 = vector.broadcast %cst_83 : f32 to vector<2x32xf32>
    %220 = arith.addf %219, %218 : vector<2x32xf32>
    %cst_84 = arith.constant 1.000000e+00 : f32
    %221 = vector.broadcast %cst_84 : f32 to vector<2x32xf32>
    %222 = arith.divf %221, %220 : vector<2x32xf32>
    %223 = vector.extract_strided_slice %202 {offsets = [0, 64], sizes = [2, 32], strides = [1, 1]} : vector<2x96xf32> to vector<2x32xf32>
    %224 = vector.extract_strided_slice %201 {offsets = [0, 64], sizes = [2, 32], strides = [1, 1]} : vector<2x96xf32> to vector<2x32xf32>
    %225 = arith.mulf %212, %224 : vector<2x32xf32>
    %226 = arith.addf %223, %225 : vector<2x32xf32>
    %227 = math.tanh %226 : vector<2x32xf32>
    %cst_85 = arith.constant 1.000000e+00 : f32
    %228 = vector.broadcast %cst_85 : f32 to vector<2x32xf32>
    %229 = arith.subf %228, %222 : vector<2x32xf32>
    %230 = arith.mulf %229, %227 : vector<2x32xf32>
    %231 = arith.mulf %222, %198 : vector<2x32xf32>
    %232 = arith.addf %230, %231 : vector<2x32xf32>
    %cst_86 = arith.constant dense<0.000000e+00> : vector<2x96xf32>
    %233 = tpu.matmul %232, %95, %cst_86 {dimension_numbers = #tpu.dot_dimension_numbers<[1], [0], [0], [1], [0, 0, 1, 1], [], []>} : vector<2x32xf32>, vector<32x96xf32>, vector<2x96xf32> -> vector<2x96xf32>
    %234 = vector.broadcast %96 : vector<1x96xf32> to vector<2x96xf32>
    %235 = arith.addf %233, %234 : vector<2x96xf32>
    %236 = vector.extract_strided_slice %85 {offsets = [8, 0], sizes = [2, 96], strides = [1, 1]} : vector<16x96xf32> to vector<2x96xf32>
    %237 = vector.extract_strided_slice %236 {offsets = [0, 0], sizes = [2, 32], strides = [1, 1]} : vector<2x96xf32> to vector<2x32xf32>
    %238 = vector.extract_strided_slice %235 {offsets = [0, 0], sizes = [2, 32], strides = [1, 1]} : vector<2x96xf32> to vector<2x32xf32>
    %239 = arith.addf %237, %238 : vector<2x32xf32>
    %cst_87 = arith.constant 0.000000e+00 : f32
    %240 = vector.broadcast %cst_87 : f32 to vector<2x32xf32>
    %241 = arith.subf %240, %239 : vector<2x32xf32>
    %242 = math.exp %241 : vector<2x32xf32>
    %cst_88 = arith.constant 1.000000e+00 : f32
    %243 = vector.broadcast %cst_88 : f32 to vector<2x32xf32>
    %244 = arith.addf %243, %242 : vector<2x32xf32>
    %cst_89 = arith.constant 1.000000e+00 : f32
    %245 = vector.broadcast %cst_89 : f32 to vector<2x32xf32>
    %246 = arith.divf %245, %244 : vector<2x32xf32>
    %247 = vector.extract_strided_slice %236 {offsets = [0, 32], sizes = [2, 32], strides = [1, 1]} : vector<2x96xf32> to vector<2x32xf32>
    %248 = vector.extract_strided_slice %235 {offsets = [0, 32], sizes = [2, 32], strides = [1, 1]} : vector<2x96xf32> to vector<2x32xf32>
    %249 = arith.addf %247, %248 : vector<2x32xf32>
    %cst_90 = arith.constant 0.000000e+00 : f32
    %250 = vector.broadcast %cst_90 : f32 to vector<2x32xf32>
    %251 = arith.subf %250, %249 : vector<2x32xf32>
    %252 = math.exp %251 : vector<2x32xf32>
    %cst_91 = arith.constant 1.000000e+00 : f32
    %253 = vector.broadcast %cst_91 : f32 to vector<2x32xf32>
    %254 = arith.addf %253, %252 : vector<2x32xf32>
    %cst_92 = arith.constant 1.000000e+00 : f32
    %255 = vector.broadcast %cst_92 : f32 to vector<2x32xf32>
    %256 = arith.divf %255, %254 : vector<2x32xf32>
    %257 = vector.extract_strided_slice %236 {offsets = [0, 64], sizes = [2, 32], strides = [1, 1]} : vector<2x96xf32> to vector<2x32xf32>
    %258 = vector.extract_strided_slice %235 {offsets = [0, 64], sizes = [2, 32], strides = [1, 1]} : vector<2x96xf32> to vector<2x32xf32>
    %259 = arith.mulf %246, %258 : vector<2x32xf32>
    %260 = arith.addf %257, %259 : vector<2x32xf32>
    %261 = math.tanh %260 : vector<2x32xf32>
    %cst_93 = arith.constant 1.000000e+00 : f32
    %262 = vector.broadcast %cst_93 : f32 to vector<2x32xf32>
    %263 = arith.subf %262, %256 : vector<2x32xf32>
    %264 = arith.mulf %263, %261 : vector<2x32xf32>
    %265 = arith.mulf %256, %232 : vector<2x32xf32>
    %266 = arith.addf %264, %265 : vector<2x32xf32>
    %cst_94 = arith.constant dense<0.000000e+00> : vector<2x96xf32>
    %267 = tpu.matmul %266, %95, %cst_94 {dimension_numbers = #tpu.dot_dimension_numbers<[1], [0], [0], [1], [0, 0, 1, 1], [], []>} : vector<2x32xf32>, vector<32x96xf32>, vector<2x96xf32> -> vector<2x96xf32>
    %268 = vector.broadcast %96 : vector<1x96xf32> to vector<2x96xf32>
    %269 = arith.addf %267, %268 : vector<2x96xf32>
    %270 = vector.extract_strided_slice %85 {offsets = [10, 0], sizes = [2, 96], strides = [1, 1]} : vector<16x96xf32> to vector<2x96xf32>
    %271 = vector.extract_strided_slice %270 {offsets = [0, 0], sizes = [2, 32], strides = [1, 1]} : vector<2x96xf32> to vector<2x32xf32>
    %272 = vector.extract_strided_slice %269 {offsets = [0, 0], sizes = [2, 32], strides = [1, 1]} : vector<2x96xf32> to vector<2x32xf32>
    %273 = arith.addf %271, %272 : vector<2x32xf32>
    %cst_95 = arith.constant 0.000000e+00 : f32
    %274 = vector.broadcast %cst_95 : f32 to vector<2x32xf32>
    %275 = arith.subf %274, %273 : vector<2x32xf32>
    %276 = math.exp %275 : vector<2x32xf32>
    %cst_96 = arith.constant 1.000000e+00 : f32
    %277 = vector.broadcast %cst_96 : f32 to vector<2x32xf32>
    %278 = arith.addf %277, %276 : vector<2x32xf32>
    %cst_97 = arith.constant 1.000000e+00 : f32
    %279 = vector.broadcast %cst_97 : f32 to vector<2x32xf32>
    %280 = arith.divf %279, %278 : vector<2x32xf32>
    %281 = vector.extract_strided_slice %270 {offsets = [0, 32], sizes = [2, 32], strides = [1, 1]} : vector<2x96xf32> to vector<2x32xf32>
    %282 = vector.extract_strided_slice %269 {offsets = [0, 32], sizes = [2, 32], strides = [1, 1]} : vector<2x96xf32> to vector<2x32xf32>
    %283 = arith.addf %281, %282 : vector<2x32xf32>
    %cst_98 = arith.constant 0.000000e+00 : f32
    %284 = vector.broadcast %cst_98 : f32 to vector<2x32xf32>
    %285 = arith.subf %284, %283 : vector<2x32xf32>
    %286 = math.exp %285 : vector<2x32xf32>
    %cst_99 = arith.constant 1.000000e+00 : f32
    %287 = vector.broadcast %cst_99 : f32 to vector<2x32xf32>
    %288 = arith.addf %287, %286 : vector<2x32xf32>
    %cst_100 = arith.constant 1.000000e+00 : f32
    %289 = vector.broadcast %cst_100 : f32 to vector<2x32xf32>
    %290 = arith.divf %289, %288 : vector<2x32xf32>
    %291 = vector.extract_strided_slice %270 {offsets = [0, 64], sizes = [2, 32], strides = [1, 1]} : vector<2x96xf32> to vector<2x32xf32>
    %292 = vector.extract_strided_slice %269 {offsets = [0, 64], sizes = [2, 32], strides = [1, 1]} : vector<2x96xf32> to vector<2x32xf32>
    %293 = arith.mulf %280, %292 : vector<2x32xf32>
    %294 = arith.addf %291, %293 : vector<2x32xf32>
    %295 = math.tanh %294 : vector<2x32xf32>
    %cst_101 = arith.constant 1.000000e+00 : f32
    %296 = vector.broadcast %cst_101 : f32 to vector<2x32xf32>
    %297 = arith.subf %296, %290 : vector<2x32xf32>
    %298 = arith.mulf %297, %295 : vector<2x32xf32>
    %299 = arith.mulf %290, %266 : vector<2x32xf32>
    %300 = arith.addf %298, %299 : vector<2x32xf32>
    %cst_102 = arith.constant dense<0.000000e+00> : vector<2x96xf32>
    %301 = tpu.matmul %300, %95, %cst_102 {dimension_numbers = #tpu.dot_dimension_numbers<[1], [0], [0], [1], [0, 0, 1, 1], [], []>} : vector<2x32xf32>, vector<32x96xf32>, vector<2x96xf32> -> vector<2x96xf32>
    %302 = vector.broadcast %96 : vector<1x96xf32> to vector<2x96xf32>
    %303 = arith.addf %301, %302 : vector<2x96xf32>
    %304 = vector.extract_strided_slice %85 {offsets = [12, 0], sizes = [2, 96], strides = [1, 1]} : vector<16x96xf32> to vector<2x96xf32>
    %305 = vector.extract_strided_slice %304 {offsets = [0, 0], sizes = [2, 32], strides = [1, 1]} : vector<2x96xf32> to vector<2x32xf32>
    %306 = vector.extract_strided_slice %303 {offsets = [0, 0], sizes = [2, 32], strides = [1, 1]} : vector<2x96xf32> to vector<2x32xf32>
    %307 = arith.addf %305, %306 : vector<2x32xf32>
    %cst_103 = arith.constant 0.000000e+00 : f32
    %308 = vector.broadcast %cst_103 : f32 to vector<2x32xf32>
    %309 = arith.subf %308, %307 : vector<2x32xf32>
    %310 = math.exp %309 : vector<2x32xf32>
    %cst_104 = arith.constant 1.000000e+00 : f32
    %311 = vector.broadcast %cst_104 : f32 to vector<2x32xf32>
    %312 = arith.addf %311, %310 : vector<2x32xf32>
    %cst_105 = arith.constant 1.000000e+00 : f32
    %313 = vector.broadcast %cst_105 : f32 to vector<2x32xf32>
    %314 = arith.divf %313, %312 : vector<2x32xf32>
    %315 = vector.extract_strided_slice %304 {offsets = [0, 32], sizes = [2, 32], strides = [1, 1]} : vector<2x96xf32> to vector<2x32xf32>
    %316 = vector.extract_strided_slice %303 {offsets = [0, 32], sizes = [2, 32], strides = [1, 1]} : vector<2x96xf32> to vector<2x32xf32>
    %317 = arith.addf %315, %316 : vector<2x32xf32>
    %cst_106 = arith.constant 0.000000e+00 : f32
    %318 = vector.broadcast %cst_106 : f32 to vector<2x32xf32>
    %319 = arith.subf %318, %317 : vector<2x32xf32>
    %320 = math.exp %319 : vector<2x32xf32>
    %cst_107 = arith.constant 1.000000e+00 : f32
    %321 = vector.broadcast %cst_107 : f32 to vector<2x32xf32>
    %322 = arith.addf %321, %320 : vector<2x32xf32>
    %cst_108 = arith.constant 1.000000e+00 : f32
    %323 = vector.broadcast %cst_108 : f32 to vector<2x32xf32>
    %324 = arith.divf %323, %322 : vector<2x32xf32>
    %325 = vector.extract_strided_slice %304 {offsets = [0, 64], sizes = [2, 32], strides = [1, 1]} : vector<2x96xf32> to vector<2x32xf32>
    %326 = vector.extract_strided_slice %303 {offsets = [0, 64], sizes = [2, 32], strides = [1, 1]} : vector<2x96xf32> to vector<2x32xf32>
    %327 = arith.mulf %314, %326 : vector<2x32xf32>
    %328 = arith.addf %325, %327 : vector<2x32xf32>
    %329 = math.tanh %328 : vector<2x32xf32>
    %cst_109 = arith.constant 1.000000e+00 : f32
    %330 = vector.broadcast %cst_109 : f32 to vector<2x32xf32>
    %331 = arith.subf %330, %324 : vector<2x32xf32>
    %332 = arith.mulf %331, %329 : vector<2x32xf32>
    %333 = arith.mulf %324, %300 : vector<2x32xf32>
    %334 = arith.addf %332, %333 : vector<2x32xf32>
    %c0_110 = arith.constant 0 : index
    %c484 = arith.constant 484 : index
    %335 = vector.load %arg2[%c0_110, %c484] : memref<64x525xf32, #tpu.memory_space<vmem>>, vector<32x41xf32>
    %c0_111 = arith.constant 0 : index
    %c420 = arith.constant 420 : index
    %336 = vector.load %arg3[%c0_111, %c420] : memref<1x461xf32, #tpu.memory_space<vmem>>, vector<1x41xf32>
    %337 = tpu.iota {dimensions = array<i32: 1>} : vector<2x41xi32>
    %cst_112 = arith.constant 0.000000e+00 : f32
    %338 = vector.broadcast %cst_112 : f32 to vector<2x1xf32>
    %cst_113 = arith.constant dense<0.000000e+00> : vector<2x41xf32>
    %339 = tpu.matmul %57, %335, %cst_113 {dimension_numbers = #tpu.dot_dimension_numbers<[1], [0], [0], [1], [0, 0, 1, 1], [], []>} : vector<2x32xf32>, vector<32x41xf32>, vector<2x41xf32> -> vector<2x41xf32>
    %340 = vector.broadcast %336 : vector<1x41xf32> to vector<2x41xf32>
    %341 = arith.addf %339, %340 : vector<2x41xf32>
    %cst_114 = arith.constant dense<0xFF800000> : vector<2xf32>
    %342 = vector.multi_reduction <maximumf>, %341, %cst_114 [1] : vector<2x41xf32> to vector<2xf32>
    %343 = vector.shape_cast %342 : vector<2xf32> to vector<2x1xf32>
    %344 = vector.broadcast %343 : vector<2x1xf32> to vector<2x41xf32>
    %345 = arith.subf %341, %344 : vector<2x41xf32>
    %346 = math.exp %345 : vector<2x41xf32>
    %cst_115 = arith.constant dense<0.000000e+00> : vector<2xf32>
    %347 = vector.multi_reduction <add>, %346, %cst_115 [1] : vector<2x41xf32> to vector<2xf32>
    %348 = vector.shape_cast %347 : vector<2xf32> to vector<2x1xf32>
    %349 = math.log %348 : vector<2x1xf32>
    %350 = arith.addf %343, %349 : vector<2x1xf32>
    %351 = vector.extract_strided_slice %94 {offsets = [0, 0], sizes = [2, 1], strides = [1, 1]} : vector<2x8xi32> to vector<2x1xi32>
    %352 = vector.broadcast %351 : vector<2x1xi32> to vector<2x41xi32>
    %353 = arith.cmpi eq, %337, %352 : vector<2x41xi32>
    %cst_116 = arith.constant 0.000000e+00 : f32
    %354 = vector.broadcast %cst_116 : f32 to vector<2x41xf32>
    %355 = arith.select %353, %341, %354 : vector<2x41xi1>, vector<2x41xf32>
    %cst_117 = arith.constant dense<0.000000e+00> : vector<2xf32>
    %356 = vector.multi_reduction <add>, %355, %cst_117 [1] : vector<2x41xf32> to vector<2xf32>
    %357 = vector.shape_cast %356 : vector<2xf32> to vector<2x1xf32>
    %358 = arith.addf %338, %357 : vector<2x1xf32>
    %359 = arith.subf %358, %350 : vector<2x1xf32>
    %cst_118 = arith.constant dense<0.000000e+00> : vector<2x41xf32>
    %360 = tpu.matmul %130, %335, %cst_118 {dimension_numbers = #tpu.dot_dimension_numbers<[1], [0], [0], [1], [0, 0, 1, 1], [], []>} : vector<2x32xf32>, vector<32x41xf32>, vector<2x41xf32> -> vector<2x41xf32>
    %361 = vector.broadcast %336 : vector<1x41xf32> to vector<2x41xf32>
    %362 = arith.addf %360, %361 : vector<2x41xf32>
    %cst_119 = arith.constant dense<0xFF800000> : vector<2xf32>
    %363 = vector.multi_reduction <maximumf>, %362, %cst_119 [1] : vector<2x41xf32> to vector<2xf32>
    %364 = vector.shape_cast %363 : vector<2xf32> to vector<2x1xf32>
    %365 = vector.broadcast %364 : vector<2x1xf32> to vector<2x41xf32>
    %366 = arith.subf %362, %365 : vector<2x41xf32>
    %367 = math.exp %366 : vector<2x41xf32>
    %cst_120 = arith.constant dense<0.000000e+00> : vector<2xf32>
    %368 = vector.multi_reduction <add>, %367, %cst_120 [1] : vector<2x41xf32> to vector<2xf32>
    %369 = vector.shape_cast %368 : vector<2xf32> to vector<2x1xf32>
    %370 = math.log %369 : vector<2x1xf32>
    %371 = arith.addf %364, %370 : vector<2x1xf32>
    %372 = vector.extract_strided_slice %94 {offsets = [0, 1], sizes = [2, 1], strides = [1, 1]} : vector<2x8xi32> to vector<2x1xi32>
    %373 = vector.broadcast %372 : vector<2x1xi32> to vector<2x41xi32>
    %374 = arith.cmpi eq, %337, %373 : vector<2x41xi32>
    %cst_121 = arith.constant 0.000000e+00 : f32
    %375 = vector.broadcast %cst_121 : f32 to vector<2x41xf32>
    %376 = arith.select %374, %362, %375 : vector<2x41xi1>, vector<2x41xf32>
    %cst_122 = arith.constant dense<0.000000e+00> : vector<2xf32>
    %377 = vector.multi_reduction <add>, %376, %cst_122 [1] : vector<2x41xf32> to vector<2xf32>
    %378 = vector.shape_cast %377 : vector<2xf32> to vector<2x1xf32>
    %379 = arith.addf %359, %378 : vector<2x1xf32>
    %380 = arith.subf %379, %371 : vector<2x1xf32>
    %cst_123 = arith.constant dense<0.000000e+00> : vector<2x41xf32>
    %381 = tpu.matmul %164, %335, %cst_123 {dimension_numbers = #tpu.dot_dimension_numbers<[1], [0], [0], [1], [0, 0, 1, 1], [], []>} : vector<2x32xf32>, vector<32x41xf32>, vector<2x41xf32> -> vector<2x41xf32>
    %382 = vector.broadcast %336 : vector<1x41xf32> to vector<2x41xf32>
    %383 = arith.addf %381, %382 : vector<2x41xf32>
    %cst_124 = arith.constant dense<0xFF800000> : vector<2xf32>
    %384 = vector.multi_reduction <maximumf>, %383, %cst_124 [1] : vector<2x41xf32> to vector<2xf32>
    %385 = vector.shape_cast %384 : vector<2xf32> to vector<2x1xf32>
    %386 = vector.broadcast %385 : vector<2x1xf32> to vector<2x41xf32>
    %387 = arith.subf %383, %386 : vector<2x41xf32>
    %388 = math.exp %387 : vector<2x41xf32>
    %cst_125 = arith.constant dense<0.000000e+00> : vector<2xf32>
    %389 = vector.multi_reduction <add>, %388, %cst_125 [1] : vector<2x41xf32> to vector<2xf32>
    %390 = vector.shape_cast %389 : vector<2xf32> to vector<2x1xf32>
    %391 = math.log %390 : vector<2x1xf32>
    %392 = arith.addf %385, %391 : vector<2x1xf32>
    %393 = vector.extract_strided_slice %94 {offsets = [0, 2], sizes = [2, 1], strides = [1, 1]} : vector<2x8xi32> to vector<2x1xi32>
    %394 = vector.broadcast %393 : vector<2x1xi32> to vector<2x41xi32>
    %395 = arith.cmpi eq, %337, %394 : vector<2x41xi32>
    %cst_126 = arith.constant 0.000000e+00 : f32
    %396 = vector.broadcast %cst_126 : f32 to vector<2x41xf32>
    %397 = arith.select %395, %383, %396 : vector<2x41xi1>, vector<2x41xf32>
    %cst_127 = arith.constant dense<0.000000e+00> : vector<2xf32>
    %398 = vector.multi_reduction <add>, %397, %cst_127 [1] : vector<2x41xf32> to vector<2xf32>
    %399 = vector.shape_cast %398 : vector<2xf32> to vector<2x1xf32>
    %400 = arith.addf %380, %399 : vector<2x1xf32>
    %401 = arith.subf %400, %392 : vector<2x1xf32>
    %cst_128 = arith.constant dense<0.000000e+00> : vector<2x41xf32>
    %402 = tpu.matmul %198, %335, %cst_128 {dimension_numbers = #tpu.dot_dimension_numbers<[1], [0], [0], [1], [0, 0, 1, 1], [], []>} : vector<2x32xf32>, vector<32x41xf32>, vector<2x41xf32> -> vector<2x41xf32>
    %403 = vector.broadcast %336 : vector<1x41xf32> to vector<2x41xf32>
    %404 = arith.addf %402, %403 : vector<2x41xf32>
    %cst_129 = arith.constant dense<0xFF800000> : vector<2xf32>
    %405 = vector.multi_reduction <maximumf>, %404, %cst_129 [1] : vector<2x41xf32> to vector<2xf32>
    %406 = vector.shape_cast %405 : vector<2xf32> to vector<2x1xf32>
    %407 = vector.broadcast %406 : vector<2x1xf32> to vector<2x41xf32>
    %408 = arith.subf %404, %407 : vector<2x41xf32>
    %409 = math.exp %408 : vector<2x41xf32>
    %cst_130 = arith.constant dense<0.000000e+00> : vector<2xf32>
    %410 = vector.multi_reduction <add>, %409, %cst_130 [1] : vector<2x41xf32> to vector<2xf32>
    %411 = vector.shape_cast %410 : vector<2xf32> to vector<2x1xf32>
    %412 = math.log %411 : vector<2x1xf32>
    %413 = arith.addf %406, %412 : vector<2x1xf32>
    %414 = vector.extract_strided_slice %94 {offsets = [0, 3], sizes = [2, 1], strides = [1, 1]} : vector<2x8xi32> to vector<2x1xi32>
    %415 = vector.broadcast %414 : vector<2x1xi32> to vector<2x41xi32>
    %416 = arith.cmpi eq, %337, %415 : vector<2x41xi32>
    %cst_131 = arith.constant 0.000000e+00 : f32
    %417 = vector.broadcast %cst_131 : f32 to vector<2x41xf32>
    %418 = arith.select %416, %404, %417 : vector<2x41xi1>, vector<2x41xf32>
    %cst_132 = arith.constant dense<0.000000e+00> : vector<2xf32>
    %419 = vector.multi_reduction <add>, %418, %cst_132 [1] : vector<2x41xf32> to vector<2xf32>
    %420 = vector.shape_cast %419 : vector<2xf32> to vector<2x1xf32>
    %421 = arith.addf %401, %420 : vector<2x1xf32>
    %422 = arith.subf %421, %413 : vector<2x1xf32>
    %cst_133 = arith.constant dense<0.000000e+00> : vector<2x41xf32>
    %423 = tpu.matmul %232, %335, %cst_133 {dimension_numbers = #tpu.dot_dimension_numbers<[1], [0], [0], [1], [0, 0, 1, 1], [], []>} : vector<2x32xf32>, vector<32x41xf32>, vector<2x41xf32> -> vector<2x41xf32>
    %424 = vector.broadcast %336 : vector<1x41xf32> to vector<2x41xf32>
    %425 = arith.addf %423, %424 : vector<2x41xf32>
    %cst_134 = arith.constant dense<0xFF800000> : vector<2xf32>
    %426 = vector.multi_reduction <maximumf>, %425, %cst_134 [1] : vector<2x41xf32> to vector<2xf32>
    %427 = vector.shape_cast %426 : vector<2xf32> to vector<2x1xf32>
    %428 = vector.broadcast %427 : vector<2x1xf32> to vector<2x41xf32>
    %429 = arith.subf %425, %428 : vector<2x41xf32>
    %430 = math.exp %429 : vector<2x41xf32>
    %cst_135 = arith.constant dense<0.000000e+00> : vector<2xf32>
    %431 = vector.multi_reduction <add>, %430, %cst_135 [1] : vector<2x41xf32> to vector<2xf32>
    %432 = vector.shape_cast %431 : vector<2xf32> to vector<2x1xf32>
    %433 = math.log %432 : vector<2x1xf32>
    %434 = arith.addf %427, %433 : vector<2x1xf32>
    %435 = vector.extract_strided_slice %94 {offsets = [0, 4], sizes = [2, 1], strides = [1, 1]} : vector<2x8xi32> to vector<2x1xi32>
    %436 = vector.broadcast %435 : vector<2x1xi32> to vector<2x41xi32>
    %437 = arith.cmpi eq, %337, %436 : vector<2x41xi32>
    %cst_136 = arith.constant 0.000000e+00 : f32
    %438 = vector.broadcast %cst_136 : f32 to vector<2x41xf32>
    %439 = arith.select %437, %425, %438 : vector<2x41xi1>, vector<2x41xf32>
    %cst_137 = arith.constant dense<0.000000e+00> : vector<2xf32>
    %440 = vector.multi_reduction <add>, %439, %cst_137 [1] : vector<2x41xf32> to vector<2xf32>
    %441 = vector.shape_cast %440 : vector<2xf32> to vector<2x1xf32>
    %442 = arith.addf %422, %441 : vector<2x1xf32>
    %443 = arith.subf %442, %434 : vector<2x1xf32>
    %cst_138 = arith.constant dense<0.000000e+00> : vector<2x41xf32>
    %444 = tpu.matmul %266, %335, %cst_138 {dimension_numbers = #tpu.dot_dimension_numbers<[1], [0], [0], [1], [0, 0, 1, 1], [], []>} : vector<2x32xf32>, vector<32x41xf32>, vector<2x41xf32> -> vector<2x41xf32>
    %445 = vector.broadcast %336 : vector<1x41xf32> to vector<2x41xf32>
    %446 = arith.addf %444, %445 : vector<2x41xf32>
    %cst_139 = arith.constant dense<0xFF800000> : vector<2xf32>
    %447 = vector.multi_reduction <maximumf>, %446, %cst_139 [1] : vector<2x41xf32> to vector<2xf32>
    %448 = vector.shape_cast %447 : vector<2xf32> to vector<2x1xf32>
    %449 = vector.broadcast %448 : vector<2x1xf32> to vector<2x41xf32>
    %450 = arith.subf %446, %449 : vector<2x41xf32>
    %451 = math.exp %450 : vector<2x41xf32>
    %cst_140 = arith.constant dense<0.000000e+00> : vector<2xf32>
    %452 = vector.multi_reduction <add>, %451, %cst_140 [1] : vector<2x41xf32> to vector<2xf32>
    %453 = vector.shape_cast %452 : vector<2xf32> to vector<2x1xf32>
    %454 = math.log %453 : vector<2x1xf32>
    %455 = arith.addf %448, %454 : vector<2x1xf32>
    %456 = vector.extract_strided_slice %94 {offsets = [0, 5], sizes = [2, 1], strides = [1, 1]} : vector<2x8xi32> to vector<2x1xi32>
    %457 = vector.broadcast %456 : vector<2x1xi32> to vector<2x41xi32>
    %458 = arith.cmpi eq, %337, %457 : vector<2x41xi32>
    %cst_141 = arith.constant 0.000000e+00 : f32
    %459 = vector.broadcast %cst_141 : f32 to vector<2x41xf32>
    %460 = arith.select %458, %446, %459 : vector<2x41xi1>, vector<2x41xf32>
    %cst_142 = arith.constant dense<0.000000e+00> : vector<2xf32>
    %461 = vector.multi_reduction <add>, %460, %cst_142 [1] : vector<2x41xf32> to vector<2xf32>
    %462 = vector.shape_cast %461 : vector<2xf32> to vector<2x1xf32>
    %463 = arith.addf %443, %462 : vector<2x1xf32>
    %464 = arith.subf %463, %455 : vector<2x1xf32>
    %cst_143 = arith.constant dense<0.000000e+00> : vector<2x41xf32>
    %465 = tpu.matmul %300, %335, %cst_143 {dimension_numbers = #tpu.dot_dimension_numbers<[1], [0], [0], [1], [0, 0, 1, 1], [], []>} : vector<2x32xf32>, vector<32x41xf32>, vector<2x41xf32> -> vector<2x41xf32>
    %466 = vector.broadcast %336 : vector<1x41xf32> to vector<2x41xf32>
    %467 = arith.addf %465, %466 : vector<2x41xf32>
    %cst_144 = arith.constant dense<0xFF800000> : vector<2xf32>
    %468 = vector.multi_reduction <maximumf>, %467, %cst_144 [1] : vector<2x41xf32> to vector<2xf32>
    %469 = vector.shape_cast %468 : vector<2xf32> to vector<2x1xf32>
    %470 = vector.broadcast %469 : vector<2x1xf32> to vector<2x41xf32>
    %471 = arith.subf %467, %470 : vector<2x41xf32>
    %472 = math.exp %471 : vector<2x41xf32>
    %cst_145 = arith.constant dense<0.000000e+00> : vector<2xf32>
    %473 = vector.multi_reduction <add>, %472, %cst_145 [1] : vector<2x41xf32> to vector<2xf32>
    %474 = vector.shape_cast %473 : vector<2xf32> to vector<2x1xf32>
    %475 = math.log %474 : vector<2x1xf32>
    %476 = arith.addf %469, %475 : vector<2x1xf32>
    %477 = vector.extract_strided_slice %94 {offsets = [0, 6], sizes = [2, 1], strides = [1, 1]} : vector<2x8xi32> to vector<2x1xi32>
    %478 = vector.broadcast %477 : vector<2x1xi32> to vector<2x41xi32>
    %479 = arith.cmpi eq, %337, %478 : vector<2x41xi32>
    %cst_146 = arith.constant 0.000000e+00 : f32
    %480 = vector.broadcast %cst_146 : f32 to vector<2x41xf32>
    %481 = arith.select %479, %467, %480 : vector<2x41xi1>, vector<2x41xf32>
    %cst_147 = arith.constant dense<0.000000e+00> : vector<2xf32>
    %482 = vector.multi_reduction <add>, %481, %cst_147 [1] : vector<2x41xf32> to vector<2xf32>
    %483 = vector.shape_cast %482 : vector<2xf32> to vector<2x1xf32>
    %484 = arith.addf %464, %483 : vector<2x1xf32>
    %485 = arith.subf %484, %476 : vector<2x1xf32>
    %cst_148 = arith.constant dense<0.000000e+00> : vector<2x41xf32>
    %486 = tpu.matmul %334, %335, %cst_148 {dimension_numbers = #tpu.dot_dimension_numbers<[1], [0], [0], [1], [0, 0, 1, 1], [], []>} : vector<2x32xf32>, vector<32x41xf32>, vector<2x41xf32> -> vector<2x41xf32>
    %487 = vector.broadcast %336 : vector<1x41xf32> to vector<2x41xf32>
    %488 = arith.addf %486, %487 : vector<2x41xf32>
    %cst_149 = arith.constant dense<0xFF800000> : vector<2xf32>
    %489 = vector.multi_reduction <maximumf>, %488, %cst_149 [1] : vector<2x41xf32> to vector<2xf32>
    %490 = vector.shape_cast %489 : vector<2xf32> to vector<2x1xf32>
    %491 = vector.broadcast %490 : vector<2x1xf32> to vector<2x41xf32>
    %492 = arith.subf %488, %491 : vector<2x41xf32>
    %493 = math.exp %492 : vector<2x41xf32>
    %cst_150 = arith.constant dense<0.000000e+00> : vector<2xf32>
    %494 = vector.multi_reduction <add>, %493, %cst_150 [1] : vector<2x41xf32> to vector<2xf32>
    %495 = vector.shape_cast %494 : vector<2xf32> to vector<2x1xf32>
    %496 = math.log %495 : vector<2x1xf32>
    %497 = arith.addf %490, %496 : vector<2x1xf32>
    %498 = vector.extract_strided_slice %94 {offsets = [0, 7], sizes = [2, 1], strides = [1, 1]} : vector<2x8xi32> to vector<2x1xi32>
    %499 = vector.broadcast %498 : vector<2x1xi32> to vector<2x41xi32>
    %500 = arith.cmpi eq, %337, %499 : vector<2x41xi32>
    %cst_151 = arith.constant 0.000000e+00 : f32
    %501 = vector.broadcast %cst_151 : f32 to vector<2x41xf32>
    %502 = arith.select %500, %488, %501 : vector<2x41xi1>, vector<2x41xf32>
    %cst_152 = arith.constant dense<0.000000e+00> : vector<2xf32>
    %503 = vector.multi_reduction <add>, %502, %cst_152 [1] : vector<2x41xf32> to vector<2xf32>
    %504 = vector.shape_cast %503 : vector<2xf32> to vector<2x1xf32>
    %505 = arith.addf %485, %504 : vector<2x1xf32>
    %506 = arith.subf %505, %497 : vector<2x1xf32>
    %cst_153 = arith.constant 0.000000e+00 : f32
    %507 = vector.broadcast %cst_153 : f32 to vector<2x128xf32>
    %c0_154 = arith.constant 0 : index
    %c0_155 = arith.constant 0 : index
    %508 = vector.load %arg4[%c0_154, %c0_155] : memref<2x128xf32, #tpu.memory_space<vmem>>, vector<2x128xf32>
    tpu.vector_store %arg4[%c0_154, %c0_155], %507 {strides = array<i32>} : memref<2x128xf32, #tpu.memory_space<vmem>>, vector<2x128xf32>,
    %c0_156 = arith.constant 0 : index
    %c0_157 = arith.constant 0 : index
    %509 = vector.load %arg4[%c0_156, %c0_157] : memref<2x128xf32, #tpu.memory_space<vmem>>, vector<2x4xf32>
    tpu.vector_store %arg4[%c0_156, %c0_157], %23 {strides = array<i32>} : memref<2x128xf32, #tpu.memory_space<vmem>>, vector<2x4xf32>,
    %c0_158 = arith.constant 0 : index
    %c4 = arith.constant 4 : index
    %510 = vector.load %arg4[%c0_158, %c4] : memref<2x128xf32, #tpu.memory_space<vmem>>, vector<2x2xf32>
    tpu.vector_store %arg4[%c0_158, %c4], %30 {strides = array<i32>} : memref<2x128xf32, #tpu.memory_space<vmem>>, vector<2x2xf32>,
    %c0_159 = arith.constant 0 : index
    %c6 = arith.constant 6 : index
    %511 = vector.load %arg4[%c0_159, %c6] : memref<2x128xf32, #tpu.memory_space<vmem>>, vector<2x1xf32>
    tpu.vector_store %arg4[%c0_159, %c6], %40 {strides = array<i32>} : memref<2x128xf32, #tpu.memory_space<vmem>>, vector<2x1xf32>,
    %c0_160 = arith.constant 0 : index
    %c7 = arith.constant 7 : index
    %512 = vector.load %arg4[%c0_160, %c7] : memref<2x128xf32, #tpu.memory_space<vmem>>, vector<2x1xf32>
    tpu.vector_store %arg4[%c0_160, %c7], %506 {strides = array<i32>} : memref<2x128xf32, #tpu.memory_space<vmem>>, vector<2x1xf32>,
    return
  }
  func.func @transform_0(%arg0: i32) -> (i32, i32) {
    %c0_i32 = arith.constant 0 : i32
    %c0_i32_0 = arith.constant 0 : i32
    %c0_i32_1 = arith.constant 0 : i32
    return %c0_i32, %c0_i32_0 : i32, i32
  }
  func.func @transform_1(%arg0: i32) -> (i32, i32) {
    %c0_i32 = arith.constant 0 : i32
    %c0_i32_0 = arith.constant 0 : i32
    %c0_i32_1 = arith.constant 0 : i32
    return %c0_i32, %c0_i32_0 : i32, i32
  }
  func.func @transform_2(%arg0: i32) -> (i32, i32) {
    %c0_i32 = arith.constant 0 : i32
    %c0_i32_0 = arith.constant 0 : i32
    %c0_i32_1 = arith.constant 0 : i32
    return %c0_i32, %c0_i32_0 : i32, i32
  }
  func.func @transform_3(%arg0: i32) -> (i32, i32) {
    %c0_i32 = arith.constant 0 : i32
    %c0_i32_0 = arith.constant 0 : i32
    %c0_i32_1 = arith.constant 0 : i32
    return %c0_i32, %c0_i32_0 : i32, i32
  }
}

</mosaic_0001>

<bundles_post_ra>
// kernel: reverse.1
= control target key start
LH: loop header
LB: loop body
LE: loop exit
PB: predicated region body
PF: predicated region fallthrough
CT: control target
= control target key end

     0   :  { %v2_v0 = vlaneseq  ;;  %s109_s0 = inlined_call_operand.vmem [shape: f32[2,8], index: 0, kind: input, shape index: {}]   ;;  %s110_s1 = inlined_call_operand.vmem [shape: f32[2,8], index: 1, kind: output, shape index: {}]  }
   0x2   :  { %v3_v1 = vsub.s32 7, %v2_v0 }
   0x4   :  { %4 = vset.pattern.permute.xlu0 %v3_v1 }
   0x5   :  { %v21_v2 = vld [vmem:[%s109_s0] sm:$0x3] }
   0x6   :  { %22 = vst [vmem:[#allocation1] sm:$0x3] %v21_v2 }
   0xd   :  { %v40_v3 = vld [vmem:[#allocation1] sm:$0x3] }
   0xe   :  { %41 = vst [vmem:[#allocation0] sm:$0x3] %v40_v3 }
  0x15   :  { %v42_v4 = vld [vmem:[#allocation0] sm:$0xff] }
  0x16   :  { %43 = vperm.xlu0 %4, %v42_v4  }
  0x88   :  { %v44_v5 = vpop.permute.xlu0 %43 }
  0x89   :  { %45 = vst [vmem:[#allocation2] sm:$0xff] %v44_v5 }
  0x90   :  { %v48_v6 = vld [vmem:[#allocation2] sm:$0x3] }
  0x91   :  { %51 = vst [vmem:[#allocation3] sm:$0x3] %v48_v6 }
  0x98   :  { %v68_v7 = vld [vmem:[#allocation3] sm:$0x3] }
  0x99   :  { %69 = vst [vmem:[%s110_s1] sm:$0x3] %v68_v7 }

// kernel: vae_solver_forward.1
= control target key start
LH: loop header
LB: loop body
LE: loop exit
PB: predicated region body
PF: predicated region fallthrough
CT: control target
= control target key end

     0   :  { %s1722_s14 = smov 127   ;;  %s1723_s4 = smov 64   ;;  %vm28_vm0 = vcmask 261120   ;;  %vm95_vm1 = vcmask 523264   ;;  %v1725_v40 = vmov 0.0   ;;  %vm1420_vm2 = vcmask 25600   ;;  %s2262_s0 = inlined_call_operand.vmem [shape: f32[16,35], index: 0, kind: input, shape index: {}]   ;;  %s2263_s1 = inlined_call_operand.vmem [shape: f32[64,525], index: 1, kind: input, shape index: {}]   ;;  %s2264_s2 = inlined_call_operand.vmem [shape: f32[1,461], index: 2, kind: input, shape index: {}]   ;;  %s2265_s3 = inlined_call_operand.vmem [shape: f32[2,128], index: 3, kind: output, shape index: {}]  }
   0x1   :  { %v1767_v0 = vld [vmem:[%s2262_s0] sm:$0x3]  ;;  %v58_v1 = vld [vmem:[%s2263_s1 + $0xf0] sm:$0xff]  ;;  %v59_v2 = vld [vmem:[%s2263_s1 + $0x118] sm:$0xff]  ;;  %s1724_s7 = smov 32   ;;  %1419 = vst [vmem:[%s2265_s3] sm:$0x3] %v1725_v40 }
   0x2   :  { %26 = vrot.lane.b32.xlu0 %v1767_v0, %s1722_s14  ;;  %v20_v3 = vld [vmem:[%s2263_s1 + $0x78] sm:$0xff]  ;;  %v1782_v4 = vld [vmem:[%s2263_s1 + $0x50] sm:$0xff]  ;;  %v56_v5 = vld [vmem:[%s2263_s1 + $0xa0] sm:$0xff]  ;;  %v1497_v11 = vpack.i.bf16 %v58_v1, %v59_v2  ;;  %s1726_s12 = smov 31   ;;  %s1727_s15 = smov 28   ;;  %vm205_vm3 = vcmask 1041408  }
   0x3   :  { %43 = vmatpush.msra.mxu0 %v20_v3  ;;  %v57_v6 = vld [vmem:[%s2263_s1 + $0xc8] sm:$0xff]  ;;  %v1798_v8 = vld [vmem:[%s2263_s1] sm:$0xff]  ;;  %v1517_v12 = vpack.i.bf16 %v1782_v4, %v20_v3  ;;  %v196_v47 = vld [vmem:[%s2263_s1 + $0x58] sm:$0xff]  ;;  %s1728_s18 = smov 92   ;;  %s1729_s21 = smov 119   ;;  %vm248_vm4 = vcmask 228352  }
   0x4   :  { %v1793_v7 = vld [vmem:[%s2263_s1 + $0x28] sm:$0xff]  ;;  %v1502_v9 = vpack.i.bf16 %v56_v5, %v57_v6  ;;  %v1642_v13 = vld [vmem:[%s2264_s2] ss:$0 sm:$0xff]  ;;  %v1527_v48 = vpack.i.bf16 %v196_v47, %v1782_v4  ;;  %s1730_s22 = smov 95   ;;  %v194_v54 = vld [vmem:[%s2263_s1 + $0x30] sm:$0xff]  ;;  %vm201_vm8 = vcmask 15360  }
   0x5   :  { %44 = vmatpush.msra.mxu0 %v1782_v4  ;;  %v1522_v10 = vpack.i.bf16 %v1798_v8, %v1793_v7  ;;  %v197_v49 = vld [vmem:[%s2263_s1 + $0x8] sm:$0x3]  ;;  %v1532_v55 = vpack.i.bf16 %v194_v54, %v1793_v7  ;;  %v14_v58 = vld [vmem:[%s2262_s0] sm:$0xff]  ;;  %v300_v3 = vld [vmem:[%s2263_s1 + $0xd0] sm:$0xff]  ;;  %vm255_vm9 = vcmask 195584   ;;  %s1732_s23 = smov 124  }
   0x6   :  { %1503 = vrot.lane.b32.xlu1 %v1502_v9, %s1723_s4  ;;  %v1846_v50 = vld [vmem:[%s2263_s1 + $0x8] sm:$0xff]  ;;  %v400_v61 = vadd.f32 1.0, %v14_v58  ;;  %v304_v62 = vld [vmem:[%s2263_s1 + $0x120] sm:$0xff]  ;;  %v301_v4 = vld [vmem:[%s2263_s1 + $0xd8] sm:$0xff]  ;;  %vm482_vm10 = vcmask 752640   ;;  %s1733_s30 = smov 60  }
   0x7   :  { %45 = vmatpush.msra.mxu0 %v1793_v7  ;;  %1513 = vrot.lane.b32.xlu2 %v1522_v10, %s1723_s4  ;;  %v1537_v51 = vpack.i.bf16 %v1846_v50, %v1798_v8  ;;  %v305_v63 = vld [vmem:[%s2263_s1 + $0x128] sm:$0xff]  ;;  %v1552_v5 = vpack.i.bf16 %v301_v4, %v300_v3  ;;  %v299_v7 = vld [vmem:[%s2263_s1 + $0xb0] sm:$0xff]  ;;  %v1955_v3 = vld [vmem:[%s2263_s1 + $0x18] sm:$0xff]  ;;  %vm551_vm11 = vcmask 490496  }
   0x8   :  { %v402_v2 = vmul.f32 20.0, %v400_v61  ;;  %v298_v6 = vld [vmem:[%s2263_s1 + $0xa8] sm:$0xff] }
   0x9   :  { %46 = vmatpush.msra.mxu0 %v1798_v8 }
   0xa   :  { %1498 = vrot.lane.b32.xlu0 %v1497_v11, %s1723_s4  ;;  %vm1460_vm5 = vcmp.lt.s32.totalorder %v402_v2, 0  ;;  %v1461_v8 = vceil.f32 %v402_v2  ;;  %v1462_v9 = vfloor.f32 %v402_v2  ;;  %v1731_v11 = vmov 0   ;;  %v1950_v2 = vld [vmem:[%s2263_s1 + $0x90] sm:$0xff] }
   0xb   :  { %1582 = vset.pattern.permute.xlu2 %v1731_v11 }
   0xe   :  { %1508 = vrot.lane.b32.xlu1 %v1517_v12, %s1723_s4 }
   0xf   :  { %1518 = vrot.lane.b32.xlu2 %v1517_v12, %s1724_s7  ;;  %v1886_v12 = vld [vmem:[%s2263_s1 + $0x60] sm:$0xff] }
  0x12   :  { %92 = vrot.lane.b32.xlu0 %v1642_v13, %s1723_s4 }
  0x16   :  { %1523 = vrot.lane.b32.xlu1 %v1522_v10, %s1724_s7  ;;  %v1557_v10 = vpack.i.bf16 %v299_v7, %v298_v6  ;;  %v1964_v7 = vld [vmem:[%s2263_s1 + $0x40] sm:$0xff] }
  0x17   :  { %136 = vrot.lane.b32.xlu2 %v1642_v13, %s1724_s7 }
  0x1f   :  { %199 = vrot.lane.b32.xlu2 %v197_v49, %s1728_s18 }
  0x27   :  { %1538 = vrot.lane.b32.xlu2 %v1537_v51, %s1727_s15 }
  0x61   :  { %v1514_v24 = vpop.permute.xlu2 %1513 }
  0x62   :  { %v1515_v25 = vunpack.i.l.bf16 %v1514_v24  ;;  %v1516_v26 = vunpack.i.h.bf16 %v1514_v24 }
  0x69   :  { %v1519_v27 = vpop.permute.xlu2 %1518 }
  0x6a   :  { %v1520_v28 = vunpack.i.l.bf16 %v1519_v27  ;;  %v1521_v29 = vunpack.i.h.bf16 %v1519_v27 }
  0x6c   :  { %154 = vmatpush.msra.mxu2 %v1520_v28 }
  0x6e   :  { %155 = vmatpush.msra.mxu2 %v1521_v29 }
  0x71   :  { %v137_v41 = vpop.permute.xlu2 %136 }
  0x74   :  { %v27_v14 = vpop.permute.xlu0 %26 }
  0x75   :  { %1435 = vmatmul.msk.f32.vlgmr.msra.gmra.mxu0 %vm28_vm0, %v27_v14  ;;  %v303_v14 = vld [vmem:[%s2263_s1 + $0x100] sm:$0xff] }
  0x78   :  { %v1504_v15 = vpop.permute.xlu1 %1503 }
  0x79   :  { %v1505_v19 = vunpack.i.l.bf16 %v1504_v15  ;;  %v1506_v20 = vunpack.i.h.bf16 %v1504_v15  ;;  %v200_v56 = vpop.permute.xlu2 %199 }
  0x7a   :  { %1439 = vmatpush.msk.msra.mxu3 %vm205_vm3, %v200_v56 }
  0x7c   :  { %v1499_v16 = vpop.permute.xlu0 %1498 }
  0x7d   :  { %v1500_v17 = vunpack.i.l.bf16 %v1499_v16  ;;  %v1501_v18 = vunpack.i.h.bf16 %v1499_v16  ;;  %v1463_v16 = vsel %vm1460_vm5, %v1461_v8, %v1462_v9  ;;  %v1588_v8 = vpack.i.bf16 %v1955_v3, %v1964_v7 }
  0x7f   :  { %107 = vmatpush.msra.mxu1 %v1500_v17  ;;  %v278_v17 = vld [vmem:[%s2264_s2] sm:$0x3] }
  0x80   :  { %v1509_v21 = vpop.permute.xlu1 %1508 }
  0x81   :  { %108 = vmatpush.msra.mxu1 %v1501_v18  ;;  %v1510_v22 = vunpack.i.l.bf16 %v1509_v21  ;;  %v1511_v23 = vunpack.i.h.bf16 %v1509_v21  ;;  %v1464_v18 = vcvt.f32.s32 %v1463_v16  ;;  %v1906_v21 = vld [vmem:[%s2263_s1 + $0x88] sm:$0xff] }
  0x82   :  { %v1593_v16 = vpack.i.bf16 %v1950_v2, %v1906_v21 }
  0x83   :  { %109 = vmatpush.msra.mxu1 %v1505_v19  ;;  %v1567_v19 = vpack.i.bf16 %v1886_v12, %v196_v47  ;;  %vm406_vm6 = vcmp.gt.s32.totalorder %v1464_v18, 0 }
  0x84   :  { %v93_v36 = vpop.permute.xlu0 %92 }
  0x85   :  { %110 = vmatpush.msra.mxu1 %v1506_v20  ;;  %v296_v20 = vld [vmem:[%s2263_s1 + $0x80] sm:$0xff] }
  0x86   :  { %v1562_v24 = vpack.i.bf16 %v1906_v21, %v296_v20 }
  0x87   :  { %111 = vmatpush.msra.mxu1 %v1510_v22  ;;  %v280_v22 = vperm.slane %v278_v17, 0 }
  0x88   :  { %v1524_v30 = vpop.permute.xlu1 %1523 }
  0x89   :  { %112 = vmatpush.msra.mxu1 %v1511_v23  ;;  %v1525_v31 = vunpack.i.l.bf16 %v1524_v30  ;;  %v1526_v35 = vunpack.i.h.bf16 %v1524_v30  ;;  %v407_v23 = vsel %vm406_vm6, %v1464_v18, 0 }
  0x8a   :  { %vm410_vm7 = vcmp.lt.s32.totalorder %v407_v23, 40 }
  0x8b   :  { %113 = vmatpush.msra.mxu1 %v1515_v25  ;;  %156 = vmatpush.msra.mxu2 %v1525_v31  ;;  %v1913_v25 = vld [vmem:[%s2263_s1 + $0x38] sm:$0xff]  ;;  %v411_v28 = vsel %vm410_vm7, %v407_v23, 40  ;;  %v281_v31 = vperm.slane %v278_v17, 1 }
  0x8c   :  { %v1572_v27 = vpack.i.bf16 %v1913_v25, %v194_v54 }
  0x8d   :  { %114 = vmatpush.msra.mxu1 %v1516_v26  ;;  %157 = vmatpush.msra.mxu2 %v1526_v35  ;;  %v1919_v26 = vld [vmem:[%s2263_s1 + $0x10] sm:$0xff]  ;;  %v1643_v35 = vld [vmem:[%s2264_s2 + $0x1] ss:$0 sm:$0xff] }
  0x8e   :  { %v1577_v29 = vpack.i.bf16 %v1919_v26, %v1846_v50  ;;  %v1608_v21 = vpack.i.bf16 %v1955_v3, %v1919_v26 }
  0xf2   :  { %v48_v32 = vpop.f32.mrf.mxu0 }
  0xf3   :  { %v49_v33 = vadd.f32 %v1642_v13, %v48_v32  ;;  %v302_v13 = vld [vmem:[%s2263_s1 + $0xf8] sm:$0xff]  ;;  %v414_v32 = vcvt.s32.f32 %v411_v28  ;;  %v1603_v28 = vpack.i.bf16 %v1964_v7, %v1913_v25 }
  0xf4   :  { %v1547_v15 = vpack.i.bf16 %v303_v14, %v302_v13 }
  0xf5   :  { %v51_v34 = vmax.f32 %v49_v33, 0.0 }
  0xf6   :  { %1548 = vrot.lane.b32.xlu2 %v1547_v15, %s1727_s15 }
  0xf7   :  { %1436 = vmatmul.msk.f32.vlgmr.msra.gmra.mxu1 %vm95_vm1, %v51_v34  ;;  %v1539_v34 = vpop.permute.xlu2 %1538 }
  0xfe   :  { %1563 = vrot.lane.b32.xlu2 %v1562_v24, %s1727_s15 }
 0x106   :  { %284 = vrot.lane.b32.xlu2 %v281_v31, %s1727_s15 }
 0x150   :  { %v1549_v47 = vpop.permute.xlu2 %1548 }
 0x151   :  { %v1550_v49 = vunpack.i.l.bf16 %v1549_v47 }
 0x158   :  { %v1564_v56 = vpop.permute.xlu2 %1563 }
 0x160   :  { %v285_v15 = vpop.permute.xlu2 %284 }
 0x174   :  { %v116_v37 = vpop.f32.mrf.mxu1 }
 0x175   :  { %v117_v38 = vadd.f32 %v116_v37, %v93_v36  ;;  %v416_v36 = vmul.f32 0.05, %v414_v32  ;;  %v1541_v37 = vunpack.i.h.bf16 %v1539_v34 }
 0x177   :  { %v119_v39 = vmax.f32 %v117_v38, 0.0  ;;  %v1540_v38 = vunpack.i.l.bf16 %v1539_v34  ;;  %v418_v40 = vadd.f32 -1.0, %v416_v36 }
 0x179   :  { %1437 = vmatmul.msk.f32.vlgmr.msra.gmra.mxu2 %vm28_vm0, %v119_v39  ;;  %423 = vperm.xlu2 %1582, %v418_v40  }
 0x181   :  { %373 = vrot.lane.b32.xlu2 %v1643_v35, %s1728_s18 }
 0x1d3   :  { %v424_v31 = vpop.permute.xlu2 %423 }
 0x1db   :  { %v1997_v40 = vpop.permute.xlu2 %373 }
 0x1fc   :  { %v159_v42 = vpop.f32.mrf.mxu2 }
 0x1fd   :  { %v1823_v43 = vadd.f32 %v159_v42, %v137_v41 }
 0x1ff   :  { %v1826_v44 = vmul.f32 0.5, %v1823_v43  ;;  %1421 = vst.msk [vmem:[%s2265_s3] sm:$0x3] %vm1420_vm2, %v1823_v43 }
 0x201   :  { %v163_v45 = vmul.f32 1.442695, %v1826_v44 }
 0x203   :  { %1645 = vpow2.f32 %v163_v45  ;;  %v249_v45 = vsel %vm248_vm4, %v1540_v38, %v1541_v37 }
 0x209   :  { %v1646_v46 = vpop.eup %1645 }
 0x20a   :  { %166 = vrot.lane.b32.xlu0 %v1646_v46, %s1726_s12 }
 0x212   :  { %1528 = vrot.lane.b32.xlu0 %v1527_v48, %s1727_s15  ;;  %v1551_v48 = vunpack.i.h.bf16 %v1549_v47 }
 0x214   :  { %v363_v54 = vsel %vm248_vm4, %v1550_v49, %v1551_v48 }
 0x21a   :  { %228 = vrot.lane.b32.xlu0 %v1767_v0, %s1729_s21 }
 0x222   :  { %1553 = vrot.lane.b32.xlu0 %v1552_v5, %s1727_s15 }
 0x22a   :  { %1568 = vrot.lane.b32.xlu0 %v1567_v19, %s1727_s15 }
 0x232   :  { %1573 = vrot.lane.b32.xlu0 %v1572_v27, %s1727_s15 }
 0x23a   :  { %433 = vrot.lane.b32.xlu0 %v1643_v35, %s1723_s4 }
 0x242   :  { %1589 = vrot.lane.b32.xlu0 %v1588_v8, %s1732_s23 }
 0x24a   :  { %1604 = vrot.lane.b32.xlu0 %v1603_v28, %s1728_s18 }
 0x27c   :  { %v167_v52 = vpop.permute.xlu0 %166 }
 0x27d   :  { %v169_v53 = vmul.f32 %v167_v52, %v1767_v0  ;;  %v1542_v0 = vpack.i.bf16 %v305_v63, %v304_v62 }
 0x27f   :  { %171 = vrot.lane.b32.xlu1 %v169_v53, %s1730_s22 }
 0x284   :  { %v1529_v57 = vpop.permute.xlu0 %1528 }
 0x285   :  { %v1531_v59 = vunpack.i.h.bf16 %v1529_v57  ;;  %v1530_v60 = vunpack.i.l.bf16 %v1529_v57 }
 0x287   :  { %1533 = vrot.lane.b32.xlu1 %v1532_v55, %s1727_s15  ;;  %v251_v1 = vsel %vm248_vm4, %v1530_v60, %v1531_v59  ;;  %v1566_v59 = vunpack.i.h.bf16 %v1564_v56  ;;  %v1565_v60 = vunpack.i.l.bf16 %v1564_v56 }
 0x288   :  { %271 = vmatpush.msrb.mxu3 %v251_v1  ;;  %v1945_v1 = vld [vmem:[%s2263_s1 + $0x68] sm:$0xff] }
 0x289   :  { %v1583_v5 = vpack.i.bf16 %v1945_v1, %v1950_v2  ;;  %v360_v6 = vsel %vm248_vm4, %v1565_v60, %v1566_v59 }
 0x28c   :  { %v229_v46 = vpop.permute.xlu0 %228 }
 0x28f   :  { %1543 = vrot.lane.b32.xlu1 %v1542_v0, %s1727_s15 }
 0x294   :  { %v1554_v55 = vpop.permute.xlu0 %1553 }
 0x295   :  { %v1556_v57 = vunpack.i.h.bf16 %v1554_v55  ;;  %v1555_v58 = vunpack.i.l.bf16 %v1554_v55 }
 0x297   :  { %1558 = vrot.lane.b32.xlu1 %v1557_v10, %s1727_s15  ;;  %v362_v0 = vsel %vm248_vm4, %v1555_v58, %v1556_v57 }
 0x29c   :  { %v1569_v9 = vpop.permute.xlu0 %1568 }
 0x29d   :  { %v1571_v10 = vunpack.i.h.bf16 %v1569_v9  ;;  %v1570_v11 = vunpack.i.l.bf16 %v1569_v9 }
 0x29f   :  { %282 = vrot.lane.b32.xlu1 %v280_v22, %s1727_s15  ;;  %v359_v14 = vsel %vm248_vm4, %v1570_v11, %v1571_v10 }
 0x2a4   :  { %v1574_v17 = vpop.permute.xlu0 %1573 }
 0x2a5   :  { %v1576_v18 = vunpack.i.h.bf16 %v1574_v17  ;;  %v1575_v19 = vunpack.i.l.bf16 %v1574_v17 }
 0x2a7   :  { %1578 = vrot.lane.b32.xlu1 %v1577_v29, %s1727_s15  ;;  %v358_v24 = vsel %vm248_vm4, %v1575_v19, %v1576_v18  ;;  %v1598_v29 = vpack.i.bf16 %v1945_v1, %v1886_v12 }
 0x2a9   :  { %1599 = vrot.lane.b32.xlu2 %v1598_v29, %s1728_s18 }
 0x2ac   :  { %v1989_v34 = vpop.permute.xlu0 %433 }
 0x2af   :  { %1584 = vrot.lane.b32.xlu1 %v1583_v5, %s1732_s23 }
 0x2b7   :  { %1594 = vrot.lane.b32.xlu1 %v1593_v16, %s1728_s18 }
 0x2bf   :  { %1609 = vrot.lane.b32.xlu1 %v1608_v21, %s1728_s18 }
 0x2f1   :  { %v172_v30 = vpop.permute.xlu1 %171 }
 0x2f2   :  { %v1927_v33 = vadd.f32 %v172_v30, %v1823_v43  ;;  %v1986_v30 = vld [vmem:[%s2263_s1 + $0x10] ss:$0 sm:$0xff] }
 0x2f3   :  { %v431_v32 = vmul.f32 %v424_v31, %v1986_v30 }
 0x2f4   :  { %1440 = vmatmul.msk.f32.vlgmr.msra.gmra.mxu3 %vm201_vm8, %v1927_v33 }
 0x2f5   :  { %v436_v25 = vadd.f32 %v1989_v34, %v431_v32 }
 0x2f7   :  { %v438_v26 = vmax.f32 %v436_v25, 0.0 }
 0x2f9   :  { %v1534_v39 = vpop.permute.xlu1 %1533  ;;  %454 = vrot.lane.b32.xlu2 %v438_v26, %s1732_s23 }
 0x2fa   :  { %v1536_v41 = vunpack.i.h.bf16 %v1534_v39  ;;  %v1535_v42 = vunpack.i.l.bf16 %v1534_v39 }
 0x2fc   :  { %v250_v43 = vsel %vm248_vm4, %v1535_v42, %v1536_v41 }
 0x2fd   :  { %272 = vmatpush.msrb.mxu3 %v250_v43 }
 0x2ff   :  { %273 = vmatpush.msrb.mxu3 %v249_v45  ;;  %v1590_v45 = vpop.permute.xlu0 %1589 }
 0x300   :  { %1441 = vmatmul.msk.f32.vlgmr.msrb.gmra.mxu3 %vm255_vm9, %v229_v46  ;;  %v2003_v46 = vunpack.i.l.bf16 %v1590_v45  ;;  %v1592_v47 = vunpack.i.h.bf16 %v1590_v45 }
 0x301   :  { %v1544_v50 = vpop.permute.xlu1 %1543 }
 0x302   :  { %v1546_v51 = vunpack.i.h.bf16 %v1544_v50  ;;  %v1545_v52 = vunpack.i.l.bf16 %v1544_v50 }
 0x303   :  { %v1600_v48 = vpop.permute.xlu2 %1599 }
 0x304   :  { %v364_v53 = vsel %vm248_vm4, %v1545_v52, %v1546_v51  ;;  %v1602_v49 = vunpack.i.h.bf16 %v1600_v48  ;;  %v1601_v50 = vunpack.i.l.bf16 %v1600_v48 }
 0x305   :  { %387 = vmatpush.msrb.mxu0 %v364_v53 }
 0x306   :  { %v485_v55 = vsel %vm482_vm10, %v1601_v50, %v1602_v49 }
 0x307   :  { %388 = vmatpush.msrb.mxu0 %v363_v54  ;;  %v1605_v56 = vpop.permute.xlu0 %1604 }
 0x308   :  { %v1607_v57 = vunpack.i.h.bf16 %v1605_v56  ;;  %v1606_v58 = vunpack.i.l.bf16 %v1605_v56 }
 0x309   :  { %v1559_v61 = vpop.permute.xlu1 %1558  ;;  %389 = vmatpush.msrb.mxu0 %v362_v0 }
 0x30a   :  { %v1561_v62 = vunpack.i.h.bf16 %v1559_v61  ;;  %v1560_v63 = vunpack.i.l.bf16 %v1559_v61 }
 0x30c   :  { %v361_v4 = vsel %vm248_vm4, %v1560_v63, %v1561_v62  ;;  %v484_v62 = vsel %vm482_vm10, %v1606_v58, %v1607_v57 }
 0x30d   :  { %390 = vmatpush.msrb.mxu0 %v361_v4  ;;  %v531_v4 = vld [vmem:[%s2264_s2 + $0x2] sm:$0x3] }
 0x30e   :  { %v533_v5 = vperm.slane %v531_v4, 0  ;;  %v534_v8 = vperm.slane %v531_v4, 1 }
 0x30f   :  { %391 = vmatpush.msrb.mxu0 %v360_v6  ;;  %v448_v6 = vld [vmem:[%s2264_s2 + $0x1] sm:$0x3] }
 0x310   :  { %v450_v9 = vperm.slane %v448_v6, 0  ;;  %547 = vrot.lane.b32.xlu0 %v533_v5, %s1733_s30  ;;  %549 = vrot.lane.b32.xlu1 %v534_v8, %s1733_s30  ;;  %v451_v10 = vperm.slane %v448_v6, 1 }
 0x311   :  { %v283_v13 = vpop.permute.xlu1 %282  ;;  %392 = vmatpush.msrb.mxu0 %v359_v14 }
 0x312   :  { %v286_v37 = vsel %vm248_vm4, %v283_v13, %v285_v15  ;;  %491 = vrot.lane.b32.xlu2 %v450_v9, %s1727_s15 }
 0x313   :  { %393 = vmatpush.msrb.mxu0 %v358_v24 }
 0x318   :  { %493 = vrot.lane.b32.xlu0 %v451_v10, %s1727_s15 }
 0x319   :  { %v1579_v20 = vpop.permute.xlu1 %1578 }
 0x31a   :  { %v1581_v22 = vunpack.i.h.bf16 %v1579_v20  ;;  %v1580_v23 = vunpack.i.l.bf16 %v1579_v20 }
 0x31c   :  { %v357_v27 = vsel %vm248_vm4, %v1580_v23, %v1581_v22 }
 0x31d   :  { %394 = vmatpush.msrb.mxu0 %v357_v27 }
 0x321   :  { %v1585_v41 = vpop.permute.xlu1 %1584 }
 0x322   :  { %v1999_v42 = vunpack.i.h.bf16 %v1585_v41  ;;  %v2001_v43 = vunpack.i.l.bf16 %v1585_v41 }
 0x324   :  { %636 = vmatpush.msrb.mxu1 %v2001_v43  ;;  %569 = vmatpush.msra.mxu3 %v2001_v43 }
 0x325   :  { %774 = vmatpush.msra.mxu0 %v2001_v43 }
 0x326   :  { %570 = vmatpush.msra.mxu3 %v1999_v42  ;;  %637 = vmatpush.msrb.mxu1 %v1999_v42 }
 0x327   :  { %775 = vmatpush.msra.mxu0 %v1999_v42 }
 0x328   :  { %571 = vmatpush.msra.mxu3 %v2003_v46  ;;  %638 = vmatpush.msrb.mxu1 %v2003_v46 }
 0x329   :  { %776 = vmatpush.msra.mxu0 %v2003_v46  ;;  %v1595_v51 = vpop.permute.xlu1 %1594 }
 0x32a   :  { %572 = vmatpush.msra.mxu3 %v1592_v47  ;;  %639 = vmatpush.msrb.mxu1 %v1592_v47  ;;  %v1597_v52 = vunpack.i.h.bf16 %v1595_v51  ;;  %v1596_v53 = vunpack.i.l.bf16 %v1595_v51 }
 0x32b   :  { %777 = vmatpush.msra.mxu0 %v1592_v47 }
 0x32c   :  { %705 = vmatpush.msrb.mxu3 %v2001_v43  ;;  %843 = vmatpush.msra.mxu1 %v2001_v43  ;;  %v486_v54 = vsel %vm482_vm10, %v1596_v53, %v1597_v52 }
 0x32d   :  { %513 = vmatpush.msrb.mxu2 %v486_v54 }
 0x32e   :  { %706 = vmatpush.msrb.mxu3 %v1999_v42  ;;  %844 = vmatpush.msra.mxu1 %v1999_v42 }
 0x32f   :  { %514 = vmatpush.msrb.mxu2 %v485_v55 }
 0x330   :  { %707 = vmatpush.msrb.mxu3 %v2003_v46  ;;  %845 = vmatpush.msra.mxu1 %v2003_v46 }
 0x331   :  { %v1610_v59 = vpop.permute.xlu1 %1609  ;;  %515 = vmatpush.msrb.mxu2 %v484_v62 }
 0x332   :  { %708 = vmatpush.msrb.mxu3 %v1592_v47  ;;  %846 = vmatpush.msra.mxu1 %v1592_v47  ;;  %v1612_v60 = vunpack.i.h.bf16 %v1610_v59  ;;  %v1611_v61 = vunpack.i.l.bf16 %v1610_v59 }
 0x334   :  { %v483_v63 = vsel %vm482_vm10, %v1611_v61, %v1612_v60 }
 0x335   :  { %516 = vmatpush.msrb.mxu2 %v483_v63 }
 0x337   :  { %908 = vmatpush.msra.mxu2 %v2001_v43 }
 0x339   :  { %909 = vmatpush.msra.mxu2 %v1999_v42 }
 0x33b   :  { %910 = vmatpush.msra.mxu2 %v2003_v46 }
 0x33d   :  { %911 = vmatpush.msra.mxu2 %v1592_v47 }
 0x353   :  { %v455_v0 = vpop.permute.xlu2 %454 }
 0x354   :  { %1443 = vmatmul.msk.f32.vlgmr.msrb.gmra.mxu2 %vm28_vm0, %v455_v0 }
 0x36c   :  { %v492_v22 = vpop.permute.xlu2 %491 }
 0x377   :  { %v225_v12 = vpop.f32.mrf.mxu3 }
 0x382   :  { %v550_v15 = vpop.permute.xlu1 %549  ;;  %v548_v16 = vpop.permute.xlu0 %547 }
 0x383   :  { %v275_v35 = vpop.f32.mrf.mxu3  ;;  %v2044_v17 = vsel %vm551_vm11, %v548_v16, %v550_v15 }
 0x384   :  { %v276_v36 = vadd.f32 %v275_v35, %v225_v12 }
 0x386   :  { %v288_v38 = vadd.f32 %v286_v37, %v276_v36 }
 0x388   :  { %v289_v39 = vmax.f32 %v288_v38, 0.0 }
 0x38a   :  { %1442 = vmatmul.msk.f32.vlgmr.msrb.gmra.mxu0 %vm95_vm1, %v289_v39  ;;  %v494_v20 = vpop.permute.xlu0 %493 }
 0x38b   :  { %v2051_v23 = vsel %vm248_vm4, %v492_v22, %v494_v20 }
 0x3d7   :  { %v518_v24 = vpop.f32.mrf.mxu2 }
 0x3d8   :  { %v2054_v27 = vadd.f32 %v518_v24, %v2051_v23 }
 0x407   :  { %v396_v11 = vpop.f32.mrf.mxu0 }
 0x408   :  { %v397_v13 = vadd.f32 %v396_v11, %v1997_v40 }
 0x40a   :  { %v2037_v14 = vmax.f32 %v397_v13, 0.0 }
 0x40c   :  { %1445 = vmatmul.msk.f32.vlgmr.msra.gmra.mxu3 %vm28_vm0, %v2037_v14 }
 0x40d   :  { %977 = vmatpush.msra.mxu3 %v2001_v43 }
 0x40f   :  { %978 = vmatpush.msra.mxu3 %v1999_v42 }
 0x411   :  { %979 = vmatpush.msra.mxu3 %v2003_v46 }
 0x413   :  { %980 = vmatpush.msra.mxu3 %v1592_v47 }
 0x48f   :  { %v574_v18 = vpop.f32.mrf.mxu3 }
 0x490   :  { %v575_v19 = vadd.f32 %v574_v18, %v2044_v17 }
 0x492   :  { %598 = vrot.lane.b32.xlu1 %v575_v19, %s1723_s4  ;;  %v577_v28 = vadd.f32 %v575_v19, %v2054_v27 }
 0x494   :  { %v578_v21 = vsub.f32 0.0, %v577_v28 }
 0x496   :  { %v579_v29 = vmul.f32 1.442695, %v578_v21 }
 0x498   :  { %1647 = vpow2.f32 %v579_v29 }
 0x49a   :  { %614 = vrot.lane.b32.xlu1 %v2037_v14, %s1724_s7  ;;  %s1734_s7 = smov 96  }
 0x49e   :  { %v1648_v31 = vpop.eup %1647 }
 0x49f   :  { %v581_v32 = vadd.f32 1.0, %v1648_v31 }
 0x4a1   :  { %1649 = vrcp.f32 %v581_v32  ;;  %v593_v37 = vand.u32 2147483648, %v581_v32  ;;  %vm587_vm13 = vweird.f32 %v581_v32  ;;  %v591_v38 = vand.u32 2147483647, %v581_v32 }
 0x4a3   :  { %v594_v40 = vor.u32 1.1754944e-38, %v593_v37  ;;  %vm592_vm15 = vcmp.eq.f32.partialorder %v591_v38, 8.507059e+37 }
 0x4a7   :  { %v1650_v25 = vpop.eup %1649 }
 0x4a8   :  { %v583_v26 = vmul.f32 %v1650_v25, %v581_v32  ;;  %vm588_vm12 = vweird.f32 %v1650_v25 }
 0x4a9   :  { %vm589_vm14 = vmor %vm587_vm13, %vm588_vm12 }
 0x4aa   :  { %v584_v12 = vsub.f32 1.0, %v583_v26 }
 0x4ac   :  { %v585_v35 = vmul.f32 %v1650_v25, %v584_v12 }
 0x4ae   :  { %v586_v36 = vadd.f32 %v1650_v25, %v585_v35 }
 0x4b0   :  { %v590_v39 = vsel %vm589_vm14, %v1650_v25, %v586_v36 }
 0x4b1   :  { %v595_v42 = vsel %vm592_vm15, %v594_v40, %v590_v39 }
 0x4b2   :  { %v608_v49 = vsub.f32 1.0, %v595_v42 }
 0x504   :  { %v599_v41 = vpop.permute.xlu1 %598 }
 0x505   :  { %v601_v43 = vmul.f32 %v599_v41, %v595_v42 }
 0x507   :  { %603 = vrot.lane.b32.xlu2 %v601_v43, %s1723_s4 }
 0x50c   :  { %v615_v48 = vpop.permute.xlu1 %614 }
 0x50d   :  { %v617_v51 = vmul.f32 %v615_v48, %v595_v42 }
 0x561   :  { %v604_v45 = vpop.permute.xlu2 %603 }
 0x562   :  { %v606_v46 = vadd.f32 %v604_v45, %v2054_v27 }
 0x564   :  { %1651 = vtanh.f32 %v606_v46 }
 0x56a   :  { %v1652_v47 = vpop.eup %1651 }
 0x56b   :  { %610 = vrot.lane.b32.xlu0 %v1652_v47, %s1734_s7 }
 0x5dd   :  { %v611_v50 = vpop.permute.xlu0 %610 }
 0x5de   :  { %v613_v52 = vmul.f32 %v611_v50, %v608_v49 }
 0x5e0   :  { %v618_v53 = vadd.f32 %v617_v51, %v613_v52 }
 0x5e2   :  { %620 = vrot.lane.b32.xlu2 %v618_v53, %s1734_s7  ;;  %v683_v22 = vrot.slane %v618_v53, 6 }
 0x63c   :  { %v2061_v54 = vpop.permute.xlu2 %620 }
 0x63d   :  { %1446 = vmatmul.msk.f32.vlgmr.msrb.gmra.mxu1 %vm28_vm0, %v2061_v54 }
 0x6ba   :  { %v641_v55 = vpop.f32.mrf.mxu1 }
 0x6bb   :  { %v642_v56 = vadd.f32 %v641_v55, %v2044_v17 }
 0x6bd   :  { %v645_v57 = vrot.slane %v642_v56, 6 }
 0x6bf   :  { %667 = vrot.lane.b32.xlu0 %v645_v57, %s1723_s4  ;;  %v647_v58 = vadd.f32 %v645_v57, %v2054_v27 }
 0x6c1   :  { %v648_v59 = vsub.f32 0.0, %v647_v58 }
 0x6c3   :  { %v649_v60 = vmul.f32 1.442695, %v648_v59 }
 0x6c5   :  { %1653 = vpow2.f32 %v649_v60 }
 0x6cb   :  { %v1654_v61 = vpop.eup %1653 }
 0x6cc   :  { %v651_v62 = vadd.f32 1.0, %v1654_v61 }
 0x6ce   :  { %1655 = vrcp.f32 %v651_v62  ;;  %v663_v8 = vand.u32 2147483648, %v651_v62  ;;  %vm657_vm2 = vweird.f32 %v651_v62  ;;  %v661_v9 = vand.u32 2147483647, %v651_v62 }
 0x6d0   :  { %v664_v11 = vor.u32 1.1754944e-38, %v663_v8  ;;  %vm662_vm5 = vcmp.eq.f32.partialorder %v661_v9, 8.507059e+37 }
 0x6d4   :  { %v1656_v63 = vpop.eup %1655 }
 0x6d5   :  { %v653_v0 = vmul.f32 %v1656_v63, %v651_v62  ;;  %vm658_vm1 = vweird.f32 %v1656_v63 }
 0x6d6   :  { %vm659_vm3 = vmor %vm657_vm2, %vm658_vm1 }
 0x6d7   :  { %v654_v4 = vsub.f32 1.0, %v653_v0 }
 0x6d9   :  { %v655_v5 = vmul.f32 %v1656_v63, %v654_v4 }
 0x6db   :  { %v656_v6 = vadd.f32 %v1656_v63, %v655_v5  ;;  %v15_v5 = vld [vmem:[%s2262_s0 + $0x8] sm:$0xff] }
 0x6dd   :  { %v660_v10 = vsel %vm659_vm3, %v1656_v63, %v656_v6  ;;  %v401_v6 = vadd.f32 1.0, %v15_v5 }
 0x6de   :  { %v665_v15 = vsel %vm662_vm5, %v664_v11, %v660_v10 }
 0x6df   :  { %v677_v24 = vsub.f32 1.0, %v665_v15  ;;  %v685_v29 = vmul.f32 %v683_v22, %v665_v15  ;;  %v403_v8 = vmul.f32 20.0, %v401_v6 }
 0x6e1   :  { %v1466_v9 = vceil.f32 %v403_v8  ;;  %v1467_v10 = vfloor.f32 %v403_v8  ;;  %vm1465_vm10 = vcmp.lt.s32.totalorder %v403_v8, 0 }
 0x6e3   :  { %v1468_v11 = vsel %vm1465_vm10, %v1466_v9, %v1467_v10 }
 0x731   :  { %v668_v13 = vpop.permute.xlu0 %667 }
 0x732   :  { %v670_v16 = vmul.f32 %v668_v13, %v665_v15  ;;  %v1469_v13 = vcvt.f32.s32 %v1468_v11 }
 0x734   :  { %672 = vrot.lane.b32.xlu1 %v670_v16, %s1723_s4  ;;  %vm408_vm11 = vcmp.gt.s32.totalorder %v1469_v13, 0 }
 0x735   :  { %v409_v15 = vsel %vm408_vm11, %v1469_v13, 0 }
 0x736   :  { %vm412_vm12 = vcmp.lt.s32.totalorder %v409_v15, 40 }
 0x737   :  { %v413_v16 = vsel %vm412_vm12, %v409_v15, 40 }
 0x7a6   :  { %v673_v18 = vpop.permute.xlu1 %672 }
 0x7a7   :  { %v675_v19 = vadd.f32 %v673_v18, %v2054_v27 }
 0x7a9   :  { %1657 = vtanh.f32 %v675_v19 }
 0x7af   :  { %v1658_v20 = vpop.eup %1657 }
 0x7b0   :  { %679 = vrot.lane.b32.xlu2 %v1658_v20, %s1734_s7  ;;  %v415_v20 = vcvt.s32.f32 %v413_v16 }
 0x80a   :  { %v680_v28 = vpop.permute.xlu2 %679 }
 0x80b   :  { %v682_v21 = vmul.f32 %v680_v28, %v677_v24  ;;  %v417_v28 = vmul.f32 0.05, %v415_v20 }
 0x80d   :  { %v686_v31 = vadd.f32 %v685_v29, %v682_v21 }
 0x80f   :  { %v688_v32 = vrot.slane %v686_v31, 2  ;;  %v752_v58 = vrot.slane %v686_v31, 6  ;;  %v419_v31 = vadd.f32 -1.0, %v417_v28 }
 0x811   :  { %689 = vrot.lane.b32.xlu0 %v688_v32, %s1734_s7 }
 0x883   :  { %v2072_v25 = vpop.permute.xlu0 %689 }
 0x884   :  { %1447 = vmatmul.msk.f32.vlgmr.msrb.gmra.mxu3 %vm28_vm0, %v2072_v25 }
 0x907   :  { %v710_v26 = vpop.f32.mrf.mxu3 }
 0x908   :  { %v711_v12 = vadd.f32 %v710_v26, %v2044_v17 }
 0x90a   :  { %v714_v35 = vrot.slane %v711_v12, 4 }
 0x90c   :  { %736 = vrot.lane.b32.xlu1 %v714_v35, %s1723_s4  ;;  %v716_v36 = vadd.f32 %v714_v35, %v2054_v27 }
 0x90e   :  { %v717_v37 = vsub.f32 0.0, %v716_v36 }
 0x910   :  { %v718_v38 = vmul.f32 1.442695, %v717_v37 }
 0x912   :  { %1659 = vpow2.f32 %v718_v38 }
 0x918   :  { %v1660_v39 = vpop.eup %1659 }
 0x919   :  { %v720_v40 = vadd.f32 1.0, %v1660_v39 }
 0x91b   :  { %1661 = vrcp.f32 %v720_v40  ;;  %v732_v47 = vand.u32 2147483648, %v720_v40  ;;  %vm726_vm7 = vweird.f32 %v720_v40  ;;  %v730_v48 = vand.u32 2147483647, %v720_v40 }
 0x91d   :  { %v733_v50 = vor.u32 1.1754944e-38, %v732_v47  ;;  %vm731_vm9 = vcmp.eq.f32.partialorder %v730_v48, 8.507059e+37 }
 0x921   :  { %v1662_v41 = vpop.eup %1661 }
 0x922   :  { %v722_v42 = vmul.f32 %v1662_v41, %v720_v40  ;;  %vm727_vm6 = vweird.f32 %v1662_v41 }
 0x923   :  { %vm728_vm8 = vmor %vm726_vm7, %vm727_vm6 }
 0x924   :  { %v723_v43 = vsub.f32 1.0, %v722_v42 }
 0x926   :  { %v724_v45 = vmul.f32 %v1662_v41, %v723_v43 }
 0x928   :  { %v725_v46 = vadd.f32 %v1662_v41, %v724_v45 }
 0x92a   :  { %v729_v49 = vsel %vm728_vm8, %v1662_v41, %v725_v46 }
 0x92b   :  { %v734_v52 = vsel %vm731_vm9, %v733_v50, %v729_v49 }
 0x92c   :  { %v746_v59 = vsub.f32 1.0, %v734_v52  ;;  %v754_v61 = vmul.f32 %v752_v58, %v734_v52 }
 0x97e   :  { %v737_v51 = vpop.permute.xlu1 %736 }
 0x97f   :  { %v739_v53 = vmul.f32 %v737_v51, %v734_v52 }
 0x981   :  { %741 = vrot.lane.b32.xlu2 %v739_v53, %s1723_s4 }
 0x9db   :  { %v742_v55 = vpop.permute.xlu2 %741 }
 0x9dc   :  { %v744_v56 = vadd.f32 %v742_v55, %v2054_v27 }
 0x9de   :  { %1663 = vtanh.f32 %v744_v56 }
 0x9e4   :  { %v1664_v57 = vpop.eup %1663 }
 0x9e5   :  { %748 = vrot.lane.b32.xlu0 %v1664_v57, %s1734_s7 }
 0xa57   :  { %v749_v60 = vpop.permute.xlu0 %748 }
 0xa58   :  { %v751_v62 = vmul.f32 %v749_v60, %v746_v59 }
 0xa5a   :  { %v755_v63 = vadd.f32 %v754_v61, %v751_v62 }
 0xa5c   :  { %v757_v0 = vrot.slane %v755_v63, 4  ;;  %v821_v42 = vrot.slane %v755_v63, 6 }
 0xa5e   :  { %758 = vrot.lane.b32.xlu1 %v757_v0, %s1734_s7 }
 0xad0   :  { %v2083_v4 = vpop.permute.xlu1 %758 }
 0xad1   :  { %1448 = vmatmul.msk.f32.vlgmr.msra.gmra.mxu0 %vm28_vm0, %v2083_v4 }
 0xb4e   :  { %v779_v18 = vpop.f32.mrf.mxu0 }
 0xb4f   :  { %v780_v19 = vadd.f32 %v779_v18, %v2044_v17 }
 0xb51   :  { %v783_v22 = vrot.slane %v780_v19, 2 }
 0xb53   :  { %v785_v24 = vadd.f32 %v783_v22, %v2054_v27  ;;  %805 = vrot.lane.b32.xlu2 %v783_v22, %s1723_s4 }
 0xb55   :  { %v786_v21 = vsub.f32 0.0, %v785_v24 }
 0xb57   :  { %v787_v29 = vmul.f32 1.442695, %v786_v21 }
 0xb59   :  { %1665 = vpow2.f32 %v787_v29 }
 0xb5b   :  { %428 = vperm.xlu2 %1582, %v419_v31  }
 0xb5f   :  { %v1666_v32 = vpop.eup %1665 }
 0xb60   :  { %v789_v26 = vadd.f32 1.0, %v1666_v32 }
 0xb62   :  { %1667 = vrcp.f32 %v789_v26  ;;  %v801_v37 = vand.u32 2147483648, %v789_v26  ;;  %v799_v39 = vand.u32 2147483647, %v789_v26  ;;  %vm795_vm14 = vweird.f32 %v789_v26 }
 0xb64   :  { %v802_v41 = vor.u32 1.1754944e-38, %v801_v37  ;;  %vm800_vm1 = vcmp.eq.f32.partialorder %v799_v39, 8.507059e+37 }
 0xb68   :  { %v1668_v12 = vpop.eup %1667 }
 0xb69   :  { %v791_v35 = vmul.f32 %v1668_v12, %v789_v26  ;;  %vm796_vm13 = vweird.f32 %v1668_v12 }
 0xb6a   :  { %vm797_vm15 = vmor %vm795_vm14, %vm796_vm13 }
 0xb6b   :  { %v792_v36 = vsub.f32 1.0, %v791_v35 }
 0xb6d   :  { %v793_v38 = vmul.f32 %v1668_v12, %v792_v36 }
 0xb6f   :  { %v794_v40 = vadd.f32 %v1668_v12, %v793_v38 }
 0xb71   :  { %v798_v43 = vsel %vm797_vm15, %v1668_v12, %v794_v40  ;;  %vm187_vm15 = vcmask 9216  }
 0xb72   :  { %v803_v45 = vsel %vm800_vm1, %v802_v41, %v798_v43 }
 0xb73   :  { %v823_v46 = vmul.f32 %v821_v42, %v803_v45  ;;  %v815_v57 = vsub.f32 1.0, %v803_v45 }
 0xbad   :  { %v806_v47 = vpop.permute.xlu2 %805 }
 0xbae   :  { %v808_v48 = vmul.f32 %v806_v47, %v803_v45 }
 0xbb0   :  { %810 = vrot.lane.b32.xlu0 %v808_v48, %s1723_s4 }
 0xbb5   :  { %v429_v51 = vpop.permute.xlu2 %428 }
 0xbb6   :  { %v432_v52 = vmul.f32 %v429_v51, %v1986_v30 }
 0xbb8   :  { %v437_v55 = vadd.f32 %v1989_v34, %v432_v52 }
 0xbba   :  { %v439_v56 = vmax.f32 %v437_v55, 0.0 }
 0xc22   :  { %v811_v49 = vpop.permute.xlu0 %810 }
 0xc23   :  { %v813_v50 = vadd.f32 %v811_v49, %v2054_v27 }
 0xc25   :  { %1669 = vtanh.f32 %v813_v50 }
 0xc2b   :  { %v1670_v53 = vpop.eup %1669 }
 0xc2c   :  { %817 = vrot.lane.b32.xlu1 %v1670_v53, %s1734_s7 }
 0xc34   :  { %456 = vrot.lane.b32.xlu1 %v439_v56, %s1732_s23 }
 0xc9e   :  { %v818_v58 = vpop.permute.xlu1 %817 }
 0xc9f   :  { %v820_v59 = vmul.f32 %v818_v58, %v815_v57 }
 0xca1   :  { %v824_v60 = vadd.f32 %v823_v46, %v820_v59 }
 0xca3   :  { %v826_v61 = vrot.slane %v824_v60, 6 }
 0xca5   :  { %827 = vrot.lane.b32.xlu0 %v826_v61, %s1734_s7 }
 0xca6   :  { %v457_v27 = vpop.permute.xlu1 %456 }
 0xca7   :  { %1444 = vmatmul.msk.f32.gmra.mxu2 %vm28_vm0, %v457_v27 }
 0xd17   :  { %v2101_v62 = vpop.permute.xlu0 %827 }
 0xd18   :  { %1449 = vmatmul.msk.f32.vlgmr.msra.gmra.mxu1 %vm28_vm0, %v2101_v62 }
 0xd2a   :  { %v521_v63 = vpop.f32.mrf.mxu2 }
 0xd2b   :  { %v2108_v0 = vadd.f32 %v521_v63, %v2051_v23 }
 0xd95   :  { %v848_v30 = vpop.f32.mrf.mxu1 }
 0xd96   :  { %v849_v34 = vadd.f32 %v848_v30, %v2044_v17 }
 0xd98   :  { %872 = vrot.lane.b32.xlu2 %v849_v34, %s1723_s4  ;;  %v851_v5 = vadd.f32 %v849_v34, %v2108_v0 }
 0xd9a   :  { %v852_v6 = vsub.f32 0.0, %v851_v5 }
 0xd9c   :  { %v853_v8 = vmul.f32 1.442695, %v852_v6 }
 0xd9e   :  { %1671 = vpow2.f32 %v853_v8 }
 0xda4   :  { %v1672_v9 = vpop.eup %1671 }
 0xda5   :  { %v855_v10 = vadd.f32 1.0, %v1672_v9 }
 0xda7   :  { %1673 = vrcp.f32 %v855_v10  ;;  %v867_v19 = vand.u32 2147483648, %v855_v10  ;;  %vm861_vm3 = vweird.f32 %v855_v10  ;;  %v865_v20 = vand.u32 2147483647, %v855_v10 }
 0xda9   :  { %v868_v22 = vor.u32 1.1754944e-38, %v867_v19  ;;  %vm866_vm6 = vcmp.eq.f32.partialorder %v865_v20, 8.507059e+37 }
 0xdad   :  { %v1674_v11 = vpop.eup %1673 }
 0xdae   :  { %v857_v13 = vmul.f32 %v1674_v11, %v855_v10  ;;  %vm862_vm2 = vweird.f32 %v1674_v11 }
 0xdaf   :  { %vm863_vm5 = vmor %vm861_vm3, %vm862_vm2 }
 0xdb0   :  { %v858_v15 = vsub.f32 1.0, %v857_v13  ;;  %v1721_v13 = vld [vmem:[%s2262_s0] sm:$0x3] }
 0xdb2   :  { %v859_v16 = vmul.f32 %v1674_v11, %v858_v15  ;;  %v175_v15 = vmul.f32 -0.5, %v1721_v13 }
 0xdb4   :  { %v860_v18 = vadd.f32 %v1674_v11, %v859_v16  ;;  %v176_v19 = vmul.f32 %v1721_v13, %v175_v15  ;;  %v1644_v15 = vld [vmem:[%s2264_s2 + $0x3] ss:$0 sm:$0xff]  ;;  %s1743_s2 = smov 4  }
 0xdb6   :  { %v864_v23 = vsel %vm863_vm5, %v1674_v11, %v860_v18  ;;  %vm1096_vm5 = vcmask 328704  }
 0xdb7   :  { %v869_v28 = vsel %vm866_vm6, %v868_v22, %v864_v23 }
 0xdb8   :  { %v882_v26 = vsub.f32 1.0, %v869_v28  ;;  %v889_v35 = vmul.f32 %v869_v28, %v826_v61 }
 0xdf2   :  { %v873_v24 = vpop.permute.xlu2 %872 }
 0xdf3   :  { %v875_v21 = vmul.f32 %v873_v24, %v869_v28 }
 0xdf5   :  { %877 = vrot.lane.b32.xlu0 %v875_v21, %s1723_s4 }
 0xe67   :  { %v878_v29 = vpop.permute.xlu0 %877 }
 0xe68   :  { %v880_v31 = vadd.f32 %v878_v29, %v2108_v0 }
 0xe6a   :  { %1675 = vtanh.f32 %v880_v31 }
 0xe70   :  { %v1676_v32 = vpop.eup %1675 }
 0xe71   :  { %884 = vrot.lane.b32.xlu1 %v1676_v32, %s1734_s7 }
 0xee3   :  { %v885_v12 = vpop.permute.xlu1 %884 }
 0xee4   :  { %v887_v36 = vmul.f32 %v885_v12, %v882_v26 }
 0xee6   :  { %v890_v37 = vadd.f32 %v889_v35, %v887_v36 }
 0xee8   :  { %892 = vrot.lane.b32.xlu2 %v890_v37, %s1734_s7  ;;  %v955_v34 = vrot.slane %v890_v37, 6 }
 0xf42   :  { %v2115_v38 = vpop.permute.xlu2 %892 }
 0xf43   :  { %1450 = vmatmul.msk.f32.vlgmr.msra.gmra.mxu2 %vm28_vm0, %v2115_v38 }
 0xfc6   :  { %v913_v39 = vpop.f32.mrf.mxu2 }
 0xfc7   :  { %v914_v40 = vadd.f32 %v913_v39, %v2044_v17 }
 0xfc9   :  { %v917_v41 = vrot.slane %v914_v40, 6 }
 0xfcb   :  { %939 = vrot.lane.b32.xlu0 %v917_v41, %s1723_s4  ;;  %v919_v42 = vadd.f32 %v917_v41, %v2108_v0 }
 0xfcd   :  { %v920_v43 = vsub.f32 0.0, %v919_v42 }
 0xfcf   :  { %v921_v45 = vmul.f32 1.442695, %v920_v43 }
 0xfd1   :  { %1677 = vpow2.f32 %v921_v45 }
 0xfd7   :  { %v1678_v46 = vpop.eup %1677 }
 0xfd8   :  { %v923_v47 = vadd.f32 1.0, %v1678_v46 }
 0xfda   :  { %1679 = vrcp.f32 %v923_v47  ;;  %v935_v53 = vand.u32 2147483648, %v923_v47  ;;  %vm929_vm8 = vweird.f32 %v923_v47  ;;  %v933_v55 = vand.u32 2147483647, %v923_v47 }
 0xfdc   :  { %v936_v57 = vor.u32 1.1754944e-38, %v935_v53  ;;  %vm934_vm10 = vcmp.eq.f32.partialorder %v933_v55, 8.507059e+37 }
 0xfe0   :  { %v1680_v48 = vpop.eup %1679 }
 0xfe1   :  { %v925_v49 = vmul.f32 %v1680_v48, %v923_v47  ;;  %vm930_vm7 = vweird.f32 %v1680_v48  ;;  %v1029_v47 = vld [vmem:[%s2263_s1 + $0x20] sm:$0xff] }
 0xfe2   :  { %vm931_vm9 = vmor %vm929_vm8, %vm930_vm7 }
 0xfe3   :  { %v926_v50 = vsub.f32 1.0, %v925_v49  ;;  %v1033_v49 = vld [vmem:[%s2263_s1 + $0x70] sm:$0xff] }
 0xfe5   :  { %v927_v51 = vmul.f32 %v1680_v48, %v926_v50  ;;  %v1623_v50 = vpack.i.bf16 %v1033_v49, %v1945_v1  ;;  %v1035_v1 = vld [vmem:[%s2263_s1 + $0x98] sm:$0xff] }
 0xfe7   :  { %v928_v52 = vadd.f32 %v1680_v48, %v927_v51 }
 0xfe9   :  { %v932_v56 = vsel %vm931_vm9, %v1680_v48, %v928_v52  ;;  %v1613_v48 = vpack.i.bf16 %v1029_v47, %v1955_v3  ;;  %v1031_v3 = vld [vmem:[%s2263_s1 + $0x48] sm:$0xff] }
 0xfea   :  { %v937_v59 = vsel %vm934_vm10, %v936_v57, %v932_v56  ;;  %v1618_v55 = vpack.i.bf16 %v1031_v3, %v1964_v7  ;;  %v1628_v56 = vpack.i.bf16 %v1035_v1, %v1950_v2  ;;  %v524_v57 = vadd.f32 1.0, %v1721_v13 }
 0xfeb   :  { %v949_v63 = vsub.f32 1.0, %v937_v59  ;;  %v957_v8 = vmul.f32 %v955_v34, %v937_v59 }
0x103d   :  { %v940_v58 = vpop.permute.xlu0 %939 }
0x103e   :  { %v942_v60 = vmul.f32 %v940_v58, %v937_v59 }
0x1040   :  { %944 = vrot.lane.b32.xlu1 %v942_v60, %s1723_s4  ;;  %v1735_v60 = vmov 1  }
0x1041   :  { %1633 = vset.pattern.permute.xlu2 %v1735_v60 }
0x10b2   :  { %v945_v61 = vpop.permute.xlu1 %944 }
0x10b3   :  { %v947_v27 = vadd.f32 %v945_v61, %v2108_v0 }
0x10b5   :  { %1681 = vtanh.f32 %v947_v27 }
0x10bb   :  { %v1682_v30 = vpop.eup %1681 }
0x10bc   :  { %951 = vrot.lane.b32.xlu2 %v1682_v30, %s1734_s7 }
0x1116   :  { %v952_v5 = vpop.permute.xlu2 %951 }
0x1117   :  { %v954_v6 = vmul.f32 %v952_v5, %v949_v63 }
0x1119   :  { %v2125_v9 = vadd.f32 %v957_v8, %v954_v6 }
0x111b   :  { %v960_v10 = vrot.slane %v2125_v9, 2  ;;  %v1024_v2 = vrot.slane %v2125_v9, 6 }
0x111d   :  { %961 = vrot.lane.b32.xlu0 %v960_v10, %s1734_s7 }
0x1125   :  { %178 = vrot.lane.b32.xlu0 %v1826_v44, %s1726_s12 }
0x118f   :  { %v2131_v11 = vpop.permute.xlu0 %961 }
0x1190   :  { %1451 = vmatmul.msk.f32.vlgmr.msra.gmra.mxu3 %vm28_vm0, %v2131_v11 }
0x1197   :  { %v179_v23 = vpop.permute.xlu0 %178 }
0x1198   :  { %v181_v22 = vsub.f32 %v176_v19, %v179_v23 }
0x119a   :  { %v1438_v44 = vadd.f32 -0.9189385, %v181_v22 }
0x1213   :  { %v982_v16 = vpop.f32.mrf.mxu3 }
0x1214   :  { %v983_v18 = vadd.f32 %v982_v16, %v2044_v17 }
0x1216   :  { %v986_v20 = vrot.slane %v983_v18, 4 }
0x1218   :  { %1008 = vrot.lane.b32.xlu1 %v986_v20, %s1723_s4  ;;  %v988_v24 = vadd.f32 %v986_v20, %v2108_v0 }
0x121a   :  { %v989_v28 = vsub.f32 0.0, %v988_v24 }
0x121c   :  { %v990_v21 = vmul.f32 1.442695, %v989_v28 }
0x121e   :  { %1683 = vpow2.f32 %v990_v21 }
0x1220   :  { %184 = vrot.lane.b32.xlu1 %v1438_v44, %s1730_s22 }
0x1224   :  { %v1684_v29 = vpop.eup %1683 }
0x1225   :  { %v992_v31 = vadd.f32 1.0, %v1684_v29 }
0x1227   :  { %1685 = vrcp.f32 %v992_v31  ;;  %v1004_v36 = vand.u32 2147483648, %v992_v31  ;;  %vm998_vm12 = vweird.f32 %v992_v31  ;;  %v1002_v37 = vand.u32 2147483647, %v992_v31 }
0x1228   :  { %1614 = vrot.lane.b32.xlu1 %v1613_v48, %s1727_s15 }
0x1229   :  { %v1005_v40 = vor.u32 1.1754944e-38, %v1004_v36  ;;  %vm1003_vm14 = vcmp.eq.f32.partialorder %v1002_v37, 8.507059e+37 }
0x122d   :  { %v1686_v32 = vpop.eup %1685 }
0x122e   :  { %v994_v26 = vmul.f32 %v1686_v32, %v992_v31  ;;  %vm999_vm11 = vweird.f32 %v1686_v32 }
0x122f   :  { %vm1000_vm13 = vmor %vm998_vm12, %vm999_vm11  ;;  %vm1425_vm12 = vcmask 42016  }
0x1230   :  { %v995_v17 = vsub.f32 1.0, %v994_v26  ;;  %1624 = vrot.lane.b32.xlu1 %v1623_v50, %s1727_s15 }
0x1232   :  { %v996_v12 = vmul.f32 %v1686_v32, %v995_v17  ;;  %v1037_v17 = vlaneseq }
0x1234   :  { %v997_v35 = vadd.f32 %v1686_v32, %v996_v12  ;;  %v2195_v12 = vand.u32 127, %v1037_v17 }
0x1236   :  { %v1001_v39 = vsel %vm1000_vm13, %v1686_v32, %v997_v35  ;;  %vm1427_vm13 = vcmask 50224  }
0x1237   :  { %v1006_v42 = vsel %vm1003_vm14, %v1005_v40, %v1001_v39  ;;  %vm1429_vm14 = vcmask 58424  }
0x1238   :  { %v1018_v34 = vsub.f32 1.0, %v1006_v42  ;;  %v1026_v5 = vmul.f32 %v1024_v2, %v1006_v42  ;;  %1073 = vrot.lane.b32.xlu1 %v1644_v15, %s1728_s18 }
0x128a   :  { %v1009_v41 = vpop.permute.xlu1 %1008 }
0x128b   :  { %v1011_v43 = vmul.f32 %v1009_v41, %v1006_v42 }
0x128d   :  { %1013 = vrot.lane.b32.xlu2 %v1011_v43, %s1723_s4 }
0x1292   :  { %v185_v45 = vpop.permute.xlu1 %184 }
0x1293   :  { %v188_v46 = vsel %vm187_vm15, %v185_v45, 0.0 }
0x129a   :  { %v1615_v8 = vpop.permute.xlu1 %1614 }
0x129b   :  { %v1617_v29 = vunpack.i.h.bf16 %v1615_v8  ;;  %v1616_v31 = vunpack.i.l.bf16 %v1615_v8 }
0x129d   :  { %v1065_v26 = vsel %vm248_vm4, %v1616_v31, %v1617_v29 }
0x12a2   :  { %v1625_v18 = vpop.permute.xlu1 %1624 }
0x12a3   :  { %v1627_v19 = vunpack.i.h.bf16 %v1625_v18  ;;  %v1626_v20 = vunpack.i.l.bf16 %v1625_v18 }
0x12a5   :  { %v1067_v21 = vsel %vm248_vm4, %v1626_v20, %v1627_v19 }
0x12aa   :  { %v2197_v35 = vpop.permute.xlu1 %1073 }
0x12b6   :  { %189 = vadd.xlane.f32.xlu2 %v188_v46 }
0x12e7   :  { %v1014_v51 = vpop.permute.xlu2 %1013 }
0x12e8   :  { %v1016_v52 = vadd.f32 %v1014_v51, %v2108_v0  ;;  %v525_v0 = vmul.f32 20.0, %v524_v57 }
0x12ea   :  { %1687 = vtanh.f32 %v1016_v52  ;;  %v1471_v58 = vceil.f32 %v525_v0  ;;  %v1472_v59 = vfloor.f32 %v525_v0  ;;  %vm1470_vm1 = vcmp.lt.s32.totalorder %v525_v0, 0 }
0x12ec   :  { %v1473_v61 = vsel %vm1470_vm1, %v1471_v58, %v1472_v59 }
0x12ed   :  { %v1474_v27 = vcvt.f32.s32 %v1473_v61 }
0x12ef   :  { %vm527_vm2 = vcmp.gt.s32.totalorder %v1474_v27, 0 }
0x12f0   :  { %v1688_v53 = vpop.eup %1687  ;;  %v528_v7 = vsel %vm527_vm2, %v1474_v27, 0 }
0x12f1   :  { %1020 = vrot.lane.b32.xlu0 %v1688_v53, %s1734_s7  ;;  %vm529_vm3 = vcmp.lt.s32.totalorder %v528_v7, 40 }
0x12f2   :  { %v2165_v30 = vsel %vm529_vm3, %v528_v7, 40  ;;  %v1737_v7 = vmov 3  }
0x12f3   :  { %1110 = vperm.xlu2 %1633, %v2165_v30   ;;  %1635 = vset.pattern.permute.xlu1 %v1737_v7 }
0x12f9   :  { %1619 = vrot.lane.b32.xlu0 %v1618_v55, %s1727_s15 }
0x1301   :  { %1629 = vrot.lane.b32.xlu0 %v1628_v56, %s1727_s15 }
0x1363   :  { %v1021_v63 = vpop.permute.xlu0 %1020 }
0x1364   :  { %v1023_v6 = vmul.f32 %v1021_v63, %v1018_v34 }
0x1366   :  { %v1027_v10 = vadd.f32 %v1026_v5, %v1023_v6 }
0x1368   :  { %v1372_v13 = vrot.slane %v1027_v10, 4 }
0x136a   :  { %1373 = vrot.lane.b32.xlu2 %v1372_v13, %s1734_s7 }
0x136b   :  { %v1620_v16 = vpop.permute.xlu0 %1619 }
0x136c   :  { %v1622_v44 = vunpack.i.h.bf16 %v1620_v16  ;;  %v1621_v24 = vunpack.i.l.bf16 %v1620_v16 }
0x136e   :  { %v1066_v32 = vsel %vm248_vm4, %v1621_v24, %v1622_v44 }
0x1373   :  { %v1630_v9 = vpop.permute.xlu0 %1629 }
0x1374   :  { %v1632_v23 = vunpack.i.h.bf16 %v1630_v9  ;;  %v1631_v22 = vunpack.i.l.bf16 %v1630_v9 }
0x1376   :  { %v1068_v28 = vsel %vm248_vm4, %v1631_v22, %v1632_v23  ;;  %v1738_v22 = vmov 4  }
0x1377   :  { %1088 = vmatpush.msrb.mxu0 %v1068_v28  ;;  %1131 = vmatpush.msrb.mxu1 %v1068_v28 }
0x1378   :  { %1173 = vmatpush.msrb.mxu2 %v1068_v28  ;;  %1215 = vmatpush.msrb.mxu3 %v1068_v28 }
0x1379   :  { %1089 = vmatpush.msrb.mxu0 %v1067_v21  ;;  %1132 = vmatpush.msrb.mxu1 %v1067_v21 }
0x137a   :  { %1174 = vmatpush.msrb.mxu2 %v1067_v21  ;;  %1216 = vmatpush.msrb.mxu3 %v1067_v21 }
0x137b   :  { %1090 = vmatpush.msrb.mxu0 %v1066_v32  ;;  %1133 = vmatpush.msrb.mxu1 %v1066_v32 }
0x137c   :  { %1175 = vmatpush.msrb.mxu2 %v1066_v32  ;;  %1217 = vmatpush.msrb.mxu3 %v1066_v32 }
0x137d   :  { %1091 = vmatpush.msrb.mxu0 %v1065_v26  ;;  %1134 = vmatpush.msrb.mxu1 %v1065_v26 }
0x137e   :  { %1176 = vmatpush.msrb.mxu2 %v1065_v26  ;;  %1218 = vmatpush.msrb.mxu3 %v1065_v26 }
0x137f   :  { %1452 = vmatmul.msk.f32.vlgmr.msrb.gmra.mxu0 %vm28_vm0, %v2037_v14  ;;  %1453 = vmatmul.msk.f32.vlgmr.msrb.gmra.mxu1 %vm28_vm0, %v2061_v54  ;;  %v2192_v14 = vpop.xlane.xlu2 %189 }
0x1380   :  { %1454 = vmatmul.msk.f32.vlgmr.msrb.gmra.mxu2 %vm28_vm0, %v2072_v25  ;;  %1455 = vmatmul.msk.f32.vlgmr.msrb.gmra.mxu3 %vm28_vm0, %v2083_v4  ;;  %v1736_v4 = vmov 2  }
0x1381   :  { %1257 = vmatpush.msra.mxu0 %v1068_v28  ;;  %1299 = vmatpush.msra.mxu1 %v1068_v28 }
0x1382   :  { %1341 = vmatpush.msra.mxu2 %v1068_v28  ;;  %1389 = vmatpush.msra.mxu3 %v1068_v28 }
0x1383   :  { %1258 = vmatpush.msra.mxu0 %v1067_v21  ;;  %1300 = vmatpush.msra.mxu1 %v1067_v21 }
0x1384   :  { %1342 = vmatpush.msra.mxu2 %v1067_v21  ;;  %1390 = vmatpush.msra.mxu3 %v1067_v21 }
0x1385   :  { %1259 = vmatpush.msra.mxu0 %v1066_v32  ;;  %1301 = vmatpush.msra.mxu1 %v1066_v32 }
0x1386   :  { %1343 = vmatpush.msra.mxu2 %v1066_v32  ;;  %1391 = vmatpush.msra.mxu3 %v1066_v32 }
0x1387   :  { %1260 = vmatpush.msra.mxu0 %v1065_v26  ;;  %1302 = vmatpush.msra.mxu1 %v1065_v26  ;;  %v1111_v54 = vpop.permute.xlu2 %1110 }
0x1388   :  { %1344 = vmatpush.msra.mxu2 %v1065_v26  ;;  %1392 = vmatpush.msra.mxu3 %v1065_v26  ;;  %vm1112_vm4 = vcmp.eq.s32.totalorder %v2195_v12, %v1111_v54 }
0x1389   :  { %1456 = vmatmul.msk.f32.vlgmr.msra.gmra.mxu0 %vm28_vm0, %v2101_v62  ;;  %1457 = vmatmul.msk.f32.vlgmr.msra.gmra.mxu1 %vm28_vm0, %v2115_v38 }
0x138a   :  { %1458 = vmatmul.msk.f32.vlgmr.msra.gmra.mxu2 %vm28_vm0, %v2131_v11  ;;  %1634 = vset.pattern.permute.xlu0 %v1736_v4 }
0x138b   :  { %1636 = vset.pattern.permute.xlu2 %v1738_v22 }
0x13c4   :  { %v1374_v25 = vpop.permute.xlu2 %1373 }
0x13c5   :  { %1459 = vmatmul.msk.f32.vlgmr.msra.gmra.mxu3 %vm28_vm0, %v1374_v25  ;;  %v1739_v25 = vmov 6  }
0x13fc   :  { %v1093_v62 = vpop.f32.mrf.mxu0  ;;  %v1136_v37 = vpop.f32.mrf.mxu1 }
0x13fd   :  { %v1094_v38 = vadd.f32 %v1093_v62, %v2197_v35  ;;  %v1137_v40 = vadd.f32 %v1136_v37, %v2197_v35 }
0x13ff   :  { %v1097_v11 = vsel %vm1096_vm5, %v1094_v38, -inf  ;;  %v1113_v36 = vsel %vm1112_vm4, %v1094_v38, 0.0  ;;  %v1139_v41 = vsel %vm1096_vm5, %v1137_v40, -inf }
0x1400   :  { %1098 = vmax.xlane.f32.xlu0 %v1097_v11  ;;  %v1114_v39 = vsel %vm1096_vm5, %v1113_v36, 0.0 }
0x1401   :  { %1115 = vadd.xlane.f32.xlu2 %v1114_v39 }
0x1403   :  { %v1220_v42 = vpop.f32.mrf.mxu3  ;;  %v1178_v0 = vpop.f32.mrf.mxu2 }
0x1404   :  { %v2207_v43 = vadd.f32 %v1220_v42, %v2197_v35  ;;  %v1179_v58 = vadd.f32 %v1178_v0, %v2197_v35 }
0x1406   :  { %v1223_v45 = vsel %vm1096_vm5, %v2207_v43, -inf  ;;  %v1181_v59 = vsel %vm1096_vm5, %v1179_v58, -inf  ;;  %v1262_v4 = vpop.f32.mrf.mxu0 }
0x1407   :  { %v1263_v17 = vadd.f32 %v1262_v4, %v2197_v35 }
0x1408   :  { %1140 = vmax.xlane.f32.xlu0 %v1139_v41 }
0x1409   :  { %v1265_v62 = vsel %vm1096_vm5, %v1263_v17, -inf }
0x141c   :  { %1152 = vperm.xlu0 %1634, %v2165_v30  }
0x1446   :  { %1224 = vmax.xlane.f32.xlu0 %v1223_v45 }
0x1473   :  { %v1099_v46 = vpop.xlane.xlu0 %1098 }
0x1474   :  { %v1100_v47 = vsub.f32 %v1094_v38, %v1099_v46  ;;  %v1116_v5 = vpop.xlane.xlu2 %1115 }
0x1476   :  { %v1101_v48 = vmul.f32 1.442695, %v1100_v47  ;;  %v1740_v47 = vmov 5  }
0x1477   :  { %1637 = vset.pattern.permute.xlu0 %v1740_v47 }
0x1478   :  { %1689 = vpow2.f32 %v1101_v48 }
0x147b   :  { %v1141_v49 = vpop.xlane.xlu0 %1140 }
0x147c   :  { %v1142_v50 = vsub.f32 %v1137_v40, %v1141_v49 }
0x147e   :  { %v1690_v51 = vpop.eup %1689  ;;  %v1143_v52 = vmul.f32 1.442695, %v1142_v50 }
0x147f   :  { %v1103_v53 = vsel %vm1096_vm5, %v1690_v51, 0.0  ;;  %v1304_v51 = vpop.f32.mrf.mxu1 }
0x1480   :  { %1691 = vpow2.f32 %v1143_v52  ;;  %1104 = vadd.xlane.f32.xlu1 %v1103_v53  ;;  %v1305_v52 = vadd.f32 %v1304_v51, %v2197_v35 }
0x1486   :  { %v1692_v3 = vpop.eup %1691 }
0x1487   :  { %v1145_v55 = vsel %vm1096_vm5, %v1692_v3, 0.0 }
0x1488   :  { %1146 = vadd.xlane.f32.xlu1 %v1145_v55 }
0x148e   :  { %v1153_v1 = vpop.permute.xlu0 %1152 }
0x148f   :  { %vm1154_vm0 = vcmp.eq.s32.totalorder %v2195_v12, %v1153_v1 }
0x1490   :  { %v1155_v56 = vsel %vm1154_vm0, %v1137_v40, 0.0 }
0x1491   :  { %v1156_v57 = vsel %vm1096_vm5, %v1155_v56, 0.0  ;;  %v1741_v56 = vmov 7  }
0x1492   :  { %1157 = vadd.xlane.f32.xlu1 %v1156_v57 }
0x149a   :  { %1182 = vmax.xlane.f32.xlu1 %v1181_v59 }
0x14b9   :  { %v1225_v44 = vpop.xlane.xlu0 %1224 }
0x14ba   :  { %v1226_v28 = vsub.f32 %v2207_v43, %v1225_v44 }
0x14bc   :  { %v1227_v21 = vmul.f32 1.442695, %v1226_v28 }
0x14f3   :  { %v1105_v60 = vpop.xlane.xlu1 %1104 }
0x14f4   :  { %1693 = vlog2.f32 %v1105_v60 }
0x14fa   :  { %v1694_v61 = vpop.eup %1693 }
0x14fb   :  { %v1147_v27 = vpop.xlane.xlu1 %1146  ;;  %v1107_v2 = vmul.f32 0.6931472, %v1694_v61 }
0x14fc   :  { %1695 = vlog2.f32 %v1147_v27 }
0x14fd   :  { %v1108_v34 = vadd.f32 %v1107_v2, %v1099_v46 }
0x14ff   :  { %v1118_v8 = vsub.f32 %v1116_v5, %v1108_v34 }
0x1502   :  { %v1696_v63 = vpop.eup %1695 }
0x1503   :  { %v1149_v6 = vmul.f32 0.6931472, %v1696_v63  ;;  %v1346_v63 = vpop.f32.mrf.mxu2 }
0x1504   :  { %v1347_v5 = vadd.f32 %v1346_v63, %v2197_v35 }
0x1505   :  { %v1150_v10 = vadd.f32 %v1149_v6, %v1141_v49  ;;  %v1158_v13 = vpop.xlane.xlu1 %1157 }
0x1506   :  { %v1159_v15 = vadd.f32 %v1158_v13, %v1118_v8  ;;  %v1307_v8 = vsel %vm1096_vm5, %v1305_v52, -inf }
0x1508   :  { %v1160_v16 = vsub.f32 %v1159_v15, %v1150_v10 }
0x150d   :  { %v1183_v18 = vpop.xlane.xlu1 %1182 }
0x150e   :  { %v1184_v19 = vsub.f32 %v1179_v58, %v1183_v18 }
0x1510   :  { %v1185_v20 = vmul.f32 1.442695, %v1184_v19 }
0x1512   :  { %1697 = vpow2.f32 %v1185_v20 }
0x1513   :  { %1699 = vpow2.f32 %v1227_v21 }
0x1518   :  { %v1698_v9 = vpop.eup %1697 }
0x1519   :  { %v1187_v23 = vsel %vm1096_vm5, %v1698_v9, 0.0  ;;  %v1700_v26 = vpop.eup %1699 }
0x151a   :  { %1188 = vadd.xlane.f32.xlu1 %v1187_v23  ;;  %v1229_v54 = vsel %vm1096_vm5, %v1700_v26, 0.0  ;;  %v1742_v23 = vmov 8  }
0x1533   :  { %1194 = vperm.xlu1 %1635, %v2165_v30  }
0x153b   :  { %1640 = vset.pattern.permute.xlu1 %v1742_v23 }
0x158d   :  { %v1189_v24 = vpop.xlane.xlu1 %1188 }
0x158e   :  { %1701 = vlog2.f32 %v1189_v24 }
0x1594   :  { %v1702_v38 = vpop.eup %1701 }
0x1595   :  { %v1191_v11 = vmul.f32 0.6931472, %v1702_v38 }
0x1597   :  { %v1192_v37 = vadd.f32 %v1191_v11, %v1183_v18 }
0x15a5   :  { %v1195_v29 = vpop.permute.xlu1 %1194 }
0x15a6   :  { %vm1196_vm6 = vcmp.eq.s32.totalorder %v2195_v12, %v1195_v29  ;;  %v1349_v29 = vsel %vm1096_vm5, %v1347_v5, -inf }
0x15a7   :  { %v1197_v31 = vsel %vm1196_vm6, %v1179_v58, 0.0 }
0x15a8   :  { %v1198_v32 = vsel %vm1096_vm5, %v1197_v31, 0.0  ;;  %v1394_v31 = vpop.f32.mrf.mxu3 }
0x15a9   :  { %1199 = vadd.xlane.f32.xlu2 %v1198_v32  ;;  %v1395_v32 = vadd.f32 %v1394_v31, %v2197_v35 }
0x15ab   :  { %v1397_v26 = vsel %vm1096_vm5, %v1395_v32, -inf }
0x15b1   :  { %1230 = vadd.xlane.f32.xlu2 %v1229_v54 }
0x15c9   :  { %1236 = vperm.xlu2 %1636, %v2165_v30  }
0x15d1   :  { %1638 = vset.pattern.permute.xlu2 %v1739_v25 }
0x15f2   :  { %1266 = vmax.xlane.f32.xlu2 %v1265_v62 }
0x160a   :  { %1320 = vperm.xlu2 %1638, %v2165_v30  }
0x161c   :  { %v1200_v36 = vpop.xlane.xlu2 %1199 }
0x161d   :  { %v1201_v39 = vadd.f32 %v1200_v36, %v1160_v16 }
0x161f   :  { %v1202_v40 = vsub.f32 %v1201_v39, %v1192_v37 }
0x1624   :  { %v1231_v41 = vpop.xlane.xlu2 %1230 }
0x162c   :  { %v1237_v42 = vpop.permute.xlu2 %1236 }
0x162d   :  { %vm1238_vm7 = vcmp.eq.s32.totalorder %v2195_v12, %v1237_v42 }
0x162e   :  { %v1239_v45 = vsel %vm1238_vm7, %v2207_v43, 0.0 }
0x162f   :  { %v1240_v46 = vsel %vm1096_vm5, %v1239_v45, 0.0 }
0x1630   :  { %1241 = vadd.xlane.f32.xlu1 %v1240_v46 }
0x1665   :  { %v1267_v48 = vpop.xlane.xlu2 %1266 }
0x1666   :  { %v1268_v49 = vsub.f32 %v1263_v17, %v1267_v48 }
0x1668   :  { %v1269_v50 = vmul.f32 1.442695, %v1268_v49 }
0x166a   :  { %1703 = vpow2.f32 %v1269_v50 }
0x166b   :  { %1705 = vlog2.f32 %v1231_v41 }
0x166d   :  { %v1321_v53 = vpop.permute.xlu2 %1320 }
0x166e   :  { %vm1322_vm8 = vcmp.eq.s32.totalorder %v2195_v12, %v1321_v53 }
0x166f   :  { %v1323_v3 = vsel %vm1322_vm8, %v1305_v52, 0.0 }
0x1670   :  { %v1704_v55 = vpop.eup %1703  ;;  %v1324_v1 = vsel %vm1096_vm5, %v1323_v3, 0.0 }
0x1671   :  { %1325 = vadd.xlane.f32.xlu2 %v1324_v1  ;;  %v1271_v43 = vsel %vm1096_vm5, %v1704_v55, 0.0  ;;  %v1706_v57 = vpop.eup %1705 }
0x1672   :  { %1272 = vadd.xlane.f32.xlu0 %v1271_v43  ;;  %v1233_v0 = vmul.f32 0.6931472, %v1706_v57 }
0x1674   :  { %v1234_v59 = vadd.f32 %v1233_v0, %v1225_v44 }
0x1686   :  { %1278 = vperm.xlu0 %1637, %v2165_v30  }
0x168e   :  { %1639 = vset.pattern.permute.xlu0 %v1741_v56 }
0x168f   :  { %1362 = vperm.xlu0 %1639, %v2165_v30  }
0x1697   :  { %1641 = vset.pattern.permute.xlu0 %v1742_v23 }
0x16a3   :  { %v1242_v58 = vpop.xlane.xlu1 %1241 }
0x16a4   :  { %v1243_v60 = vadd.f32 %v1242_v58, %v1202_v40 }
0x16a6   :  { %v1244_v61 = vsub.f32 %v1243_v60, %v1234_v59 }
0x16e4   :  { %v1326_v62 = vpop.xlane.xlu2 %1325 }
0x16e5   :  { %v1273_v27 = vpop.xlane.xlu0 %1272 }
0x16e6   :  { %1707 = vlog2.f32 %v1273_v27 }
0x16ec   :  { %v1708_v15 = vpop.eup %1707 }
0x16ed   :  { %v1275_v16 = vmul.f32 0.6931472, %v1708_v15 }
0x16ef   :  { %v1276_v19 = vadd.f32 %v1275_v16, %v1267_v48 }
0x16f8   :  { %v1279_v7 = vpop.permute.xlu0 %1278 }
0x16f9   :  { %vm1280_vm9 = vcmp.eq.s32.totalorder %v2195_v12, %v1279_v7 }
0x16fa   :  { %v1281_v2 = vsel %vm1280_vm9, %v1263_v17, 0.0 }
0x16fb   :  { %v1282_v34 = vsel %vm1096_vm5, %v1281_v2, 0.0 }
0x16fc   :  { %1283 = vadd.xlane.f32.xlu1 %v1282_v34 }
0x1701   :  { %v1363_v6 = vpop.permute.xlu0 %1362 }
0x1702   :  { %vm1364_vm10 = vcmp.eq.s32.totalorder %v2195_v12, %v1363_v6 }
0x1703   :  { %v1365_v10 = vsel %vm1364_vm10, %v1347_v5, 0.0 }
0x1704   :  { %1308 = vmax.xlane.f32.xlu1 %v1307_v8  ;;  %v1366_v13 = vsel %vm1096_vm5, %v1365_v10, 0.0 }
0x1705   :  { %1367 = vadd.xlane.f32.xlu2 %v1366_v13 }
0x176f   :  { %v1284_v18 = vpop.xlane.xlu1 %1283 }
0x1770   :  { %v1285_v20 = vadd.f32 %v1284_v18, %v1244_v61 }
0x1772   :  { %v1286_v9 = vsub.f32 %v1285_v20, %v1276_v19 }
0x1774   :  { %v1327_v11 = vadd.f32 %v1326_v62, %v1286_v9 }
0x1777   :  { %v1309_v22 = vpop.xlane.xlu1 %1308 }
0x1778   :  { %v1310_v44 = vsub.f32 %v1305_v52, %v1309_v22  ;;  %v1368_v3 = vpop.xlane.xlu2 %1367 }
0x177a   :  { %v1311_v24 = vmul.f32 1.442695, %v1310_v44 }
0x177c   :  { %1709 = vpow2.f32 %v1311_v24 }
0x1782   :  { %v1710_v28 = vpop.eup %1709 }
0x1783   :  { %v1313_v21 = vsel %vm1096_vm5, %v1710_v28, 0.0 }
0x1784   :  { %1314 = vadd.xlane.f32.xlu1 %v1313_v21 }
0x178c   :  { %1350 = vmax.xlane.f32.xlu1 %v1349_v29 }
0x1794   :  { %1398 = vmax.xlane.f32.xlu1 %v1397_v26 }
0x17ad   :  { %1410 = vperm.xlu1 %1640, %v2165_v30  }
0x17f7   :  { %v1315_v54 = vpop.xlane.xlu1 %1314 }
0x17f8   :  { %1711 = vlog2.f32 %v1315_v54 }
0x17fe   :  { %v1712_v25 = vpop.eup %1711 }
0x17ff   :  { %v1317_v4 = vmul.f32 0.6931472, %v1712_v25  ;;  %v1351_v17 = vpop.xlane.xlu1 %1350 }
0x1800   :  { %v1352_v38 = vsub.f32 %v1347_v5, %v1351_v17 }
0x1801   :  { %v1318_v36 = vadd.f32 %v1317_v4, %v1309_v22 }
0x1802   :  { %v1353_v37 = vmul.f32 1.442695, %v1352_v38 }
0x1803   :  { %v1328_v39 = vsub.f32 %v1327_v11, %v1318_v36 }
0x1804   :  { %1713 = vpow2.f32 %v1353_v37 }
0x1807   :  { %v1399_v40 = vpop.xlane.xlu1 %1398 }
0x1808   :  { %v1400_v41 = vsub.f32 %v1395_v32, %v1399_v40 }
0x180a   :  { %v1714_v35 = vpop.eup %1713  ;;  %v1401_v42 = vmul.f32 1.442695, %v1400_v41 }
0x180b   :  { %v1355_v45 = vsel %vm1096_vm5, %v1714_v35, 0.0 }
0x180c   :  { %1715 = vpow2.f32 %v1401_v42  ;;  %1356 = vadd.xlane.f32.xlu0 %v1355_v45 }
0x1812   :  { %v1716_v30 = vpop.eup %1715 }
0x1813   :  { %v1403_v46 = vsel %vm1096_vm5, %v1716_v30, 0.0 }
0x1814   :  { %1404 = vadd.xlane.f32.xlu1 %v1403_v46 }
0x181f   :  { %v1411_v47 = vpop.permute.xlu1 %1410 }
0x1820   :  { %vm1412_vm11 = vcmp.eq.s32.totalorder %v2195_v12, %v1411_v47  ;;  %1422 = vrot.lane.b32.xlu0 %v1927_v33, %s1743_s2  ;;  %v1369_v33 = vadd.f32 %v1368_v3, %v1328_v39 }
0x1821   :  { %v1413_v48 = vsel %vm1412_vm11, %v1395_v32, 0.0 }
0x1822   :  { %v1414_v49 = vsel %vm1096_vm5, %v1413_v48, 0.0 }
0x1823   :  { %1415 = vadd.xlane.f32.xlu2 %v1414_v49 }
0x187f   :  { %v1357_v50 = vpop.xlane.xlu0 %1356 }
0x1880   :  { %1717 = vlog2.f32 %v1357_v50 }
0x1886   :  { %v1718_v52 = vpop.eup %1717 }
0x1887   :  { %v1405_v51 = vpop.xlane.xlu1 %1404  ;;  %v1359_v53 = vmul.f32 0.6931472, %v1718_v52 }
0x1888   :  { %1719 = vlog2.f32 %v1405_v51 }
0x1889   :  { %v1360_v1 = vadd.f32 %v1359_v53, %v1351_v17 }
0x188b   :  { %v1370_v56 = vsub.f32 %v1369_v33, %v1360_v1 }
0x188e   :  { %v1720_v55 = vpop.eup %1719 }
0x188f   :  { %v1407_v12 = vmul.f32 0.6931472, %v1720_v55 }
0x1891   :  { %v1408_v0 = vadd.f32 %v1407_v12, %v1399_v40 }
0x1892   :  { %v1423_v43 = vpop.permute.xlu0 %1422 }
0x1893   :  { %1426 = vst.msk [vmem:[%s2265_s3] sm:$0x3] %vm1425_vm12, %v1423_v43 }
0x1894   :  { %1428 = vst.msk [vmem:[%s2265_s3] sm:$0x3] %vm1427_vm13, %v2192_v14 }
0x1896   :  { %v1416_v57 = vpop.xlane.xlu2 %1415 }
0x1897   :  { %v1417_v58 = vadd.f32 %v1416_v57, %v1370_v56 }
0x1899   :  { %v1418_v59 = vsub.f32 %v1417_v58, %v1408_v0 }
0x189b   :  { %1430 = vst.msk [vmem:[%s2265_s3] sm:$0x3] %vm1429_vm14, %v1418_v59 }

</bundles_post_ra>
